<compile_context>
chip_gen: v5e
topology: v5e:2x2
jax: 0.10.0
libtpu: 0.0.40
codegen_flags: <defaults>
</compile_context>

<pallas_src>
import math

import jax
import jax.numpy as jnp
import numpy as np
from jax.experimental import pallas as pl
from jax.experimental.pallas import tpu as pltpu

_LOG_2PI = math.log(2.0 * math.pi)
_NEG_BIG = -1e30                      # finite "-inf" for online-LSE init
_SLAB_BUDGET = 18 * 1024 * 1024       # bytes for fused-slab temporaries (v7x-safe)
_VMEM_LIMIT = 32 * 1024 * 1024


def _round_up(n, m):
    return ((n + m - 1) // m) * m


def _choose_i_tiling(B):
    """Pad the i side to a sublane multiple; pick bi so the 'parallel' grid
    axis has >= 2 blocks whenever possible (megacore on v7x)."""
    if B >= 128:
        return _round_up(B, 64), 64
    Bp = _round_up(B, 8)
    for c in (64, 32, 16, 8):
        if Bp % c == 0 and Bp // c >= 2:
            return Bp, c
    return Bp, min(Bp, 8)     # tiny batch: single i block


def _choose_j_tiling(B, D, bi, slab_budget_bytes):
    """Pad the j side to a lane multiple (128); pick the largest bj that keeps
    the fused (bi*D, bj) slab temporaries inside the VMEM budget."""
    Bp = _round_up(B, 128)
    bj = 128
    for c in (2048, 1024, 512, 256):
        if Bp % c == 0:
            bj = c
            break
    while bj > 128 and 4 * bi * D * bj * 4 > slab_budget_bytes:
        bj //= 2
    return Bp, bj


def _sublane_tile(x, reps):
    """Replicate a (R, C) tile `reps` times along sublanes via log-doubling
    concatenations (Mosaic-friendly; avoids reshape-based tiling)."""
    out, n = x, 1
    while 2 * n <= reps:
        out = jnp.concatenate([out, out], axis=0)
        n *= 2
    if n < reps:
        out = jnp.concatenate([out, _sublane_tile(x, reps - n)], axis=0)
    return out


def _make_main_kernel(B, D, bi, bj, dataset_size, prior_mu, prior_sigma):
    log_bn = math.log(B * dataset_size)
    prior_logvar = math.log(prior_sigma ** 2)
    slab_rows = bi * D

    def kernel(z_ref, mu_ref, lv_ref, zf_ref,
               muT_ref, ivT_ref, kT_ref, muivT_ref, cj_ref,
               out_ref, mj_ref, sj_ref, md_ref, sd_ref):
        j = pl.program_id(1)
        nj = pl.num_programs(1)

        @pl.when(j == 0)
        def _init():
            mj_ref[...] = jnp.full((bi, 1), _NEG_BIG, jnp.float32)
            sj_ref[...] = jnp.zeros((bi, 1), jnp.float32)
            md_ref[...] = jnp.full((slab_rows, 1), _NEG_BIG, jnp.float32)
            sd_ref[...] = jnp.zeros((slab_rows, 1), jnp.float32)

        z = z_ref[...]                       # (bi, D)   i-side samples
        ivT = ivT_ref[...]                   # (D, bj)   1/sigma^2 (hoisted)

        # --- joint term on the MXU (never materializes (B,B,D)) --------------
        # NOTE: quadratic expansion may lose precision when logvar << 0 and
        # z ~= mu; kept on the MXU (otherwise-idle slot) per review.
        q1 = jnp.dot(z * z, ivT, preferred_element_type=jnp.float32,
                     precision=jax.lax.Precision.HIGHEST)               # (bi,bj)
        q2 = jnp.dot(z, muivT_ref[...], preferred_element_type=jnp.float32,
                     precision=jax.lax.Precision.HIGHEST)               # (bi,bj)
        s = -0.5 * (q1 - 2.0 * q2 + cj_ref[...] + D * _LOG_2PI)         # (bi,bj)

        m_old = mj_ref[...]
        m_new = jnp.maximum(m_old, jnp.max(s, axis=1, keepdims=True))
        sj_ref[...] = (sj_ref[...] * jnp.exp(m_old - m_new)
                       + jnp.sum(jnp.exp(s - m_new), axis=1, keepdims=True))
        mj_ref[...] = m_new

        # --- fused per-latent-dim slab: rows = (i, d) pairs, lanes = j --------
        mu_b = _sublane_tile(muT_ref[...], bi)                          # (bi*D,bj)
        iv_b = _sublane_tile(ivT, bi)
        k_b = _sublane_tile(kT_ref[...], bi)                            # -0.5(lv+c)
        t = zf_ref[...] - mu_b                                          # (bi*D,bj)
        ld = k_b - 0.5 * (t * t) * iv_b                                 # (bi*D,bj)

        md_old = md_ref[...]
        md_new = jnp.maximum(md_old, jnp.max(ld, axis=1, keepdims=True))
        sd_ref[...] = (sd_ref[...] * jnp.exp(md_old - md_new)
                       + jnp.sum(jnp.exp(ld - md_new), axis=1, keepdims=True))
        md_ref[...] = md_new

        # --- finalize this i-block on the last j step -------------------------
        @pl.when(j == nj - 1)
        def _finalize():
            logqz = mj_ref[...] + jnp.log(sj_ref[...]) - log_bn          # (bi,1)

            lse = md_ref[...] + jnp.log(sd_ref[...])                     # (bi*D,1)
            # Per-sample sum over d via a 0/1 selection matmul (runs once per
            # i block; avoids sublane-regrouping reshapes).
            r_idx = jax.lax.broadcasted_iota(jnp.int32, (bi, slab_rows), 0)
            c_idx = jax.lax.broadcasted_iota(jnp.int32, (bi, slab_rows), 1)
            sel = jnp.where((c_idx >= r_idx * D) & (c_idx < r_idx * D + D),
                            1.0, 0.0)
            logqz_pm = (jnp.dot(sel, lse, preferred_element_type=jnp.float32,
                                precision=jax.lax.Precision.HIGHEST)
                        - D * log_bn)                                    # (bi,1)

            mu_i = mu_ref[...]
            lv_i = lv_ref[...]
            t_q = (z - mu_i) * jnp.exp(-0.5 * lv_i)
            lqgx = jnp.sum(-0.5 * (t_q * t_q + lv_i + _LOG_2PI),
                           axis=1, keepdims=True)                        # (bi,1)
            t_p = (z - prior_mu) * math.exp(-0.5 * prior_logvar)
            logpz = jnp.sum(-0.5 * (t_p * t_p + prior_logvar + _LOG_2PI),
                            axis=1, keepdims=True)                       # (bi,1)
            kld_row = jnp.sum(1.0 + lv_i - mu_i * mu_i - jnp.exp(lv_i),
                              axis=1, keepdims=True)                     # (bi,1)

            col = jax.lax.broadcasted_iota(jnp.int32, (bi, 128), 1)
            packed = jnp.where(col == 0, lqgx - logqz,
                     jnp.where(col == 1, logqz - logqz_pm,
                     jnp.where(col == 2, logqz_pm - logpz,
                     jnp.where(col == 3, kld_row, 0.0))))
            out_ref[...] = packed

    return kernel


def _rec_kernel(x_ref, x0_ref, out_ref):
    @pl.when(pl.program_id(1) == 0)
    def _init():
        out_ref[...] = jnp.zeros_like(out_ref)
    d = x0_ref[...] - x_ref[...]
    out_ref[...] = out_ref[...] + jnp.sum(d * d, keepdims=True)


def _mse_mean(x, x0):
    """mean((x0 - x)**2) as a Pallas reduction: row-block axis is 'parallel'
    (megacore-shardable), column axis streams; each row block writes a
    lane-dense (1, 128) partial sum finished in the wrapper."""
    n_elem = x.size
    B = x.shape[0]
    x2 = x.reshape(B, -1)
    x02 = x0.reshape(B, -1)
    P = x2.shape[1]

    if P <= 2048:
        bp = P
    else:
        bp = 512
        for c in (2048, 1024, 512):
            if P % c == 0:
                bp = c
                break
    Pp = _round_up(P, bp)

    if B >= 128:
        br = 64
        Bp = _round_up(B, 64)
    elif B >= 16 and B % 8 == 0:
        br, Bp = 8, B
    else:
        br, Bp = B, B

    if (Bp, Pp) != (B, P):
        x2 = jnp.pad(x2, ((0, Bp - B), (0, Pp - P)))
        x02 = jnp.pad(x02, ((0, Bp - B), (0, Pp - P)))

    partial = pl.pallas_call(
        _rec_kernel,
        out_shape=jax.ShapeDtypeStruct((Bp // br, 128), jnp.float32),
        grid_spec=pltpu.PrefetchScalarGridSpec(
            num_scalar_prefetch=0,
            grid=(Bp // br, Pp // bp),
            in_specs=[pl.BlockSpec((br, bp), lambda i, j: (i, j)),
                      pl.BlockSpec((br, bp), lambda i, j: (i, j))],
            out_specs=pl.BlockSpec((1, 128), lambda i, j: (i, 0))),
        compiler_params=pltpu.CompilerParams(
            dimension_semantics=("parallel", "arbitrary"),
            vmem_limit_bytes=_VMEM_LIMIT),
    )(x2, x02)
    return jnp.sum(partial[:, 0]) / n_elem


def make_tcvae_loss(dataset_size, prior_mu=0.0, prior_sigma=1.0):
    """Returns fn(x, x0, z, mu, logvar) -> (rec, kld, mi, tc, dwkl) scalars."""

    def loss_fn(x, x0, z, mu, logvar):
        x = jnp.asarray(x, jnp.float32)
        x0 = jnp.asarray(x0, jnp.float32)
        z = jnp.asarray(z, jnp.float32)
        mu = jnp.asarray(mu, jnp.float32)
        logvar = jnp.asarray(logvar, jnp.float32)

        B, D = z.shape

        # ---- tiling (padded path for non-divisible B) ------------------------
        Bp_i, bi = _choose_i_tiling(B)
        Bp_j, bj = _choose_j_tiling(B, D, bi, _SLAB_BUDGET)
        while 4 * bi * D * bj * 4 > _SLAB_BUDGET and bi > 8:
            bi //= 2
        ni, nj = Bp_i // bi, Bp_j // bj

        # i-side inputs (zero padded rows are sliced off after the kernel)
        pad_i = Bp_i - B
        z_i = jnp.pad(z, ((0, pad_i), (0, 0)))
        mu_i = jnp.pad(mu, ((0, pad_i), (0, 0)))
        lv_i = jnp.pad(logvar, ((0, pad_i), (0, 0)))
        zf = z_i.reshape(Bp_i * D, 1)            # i-major (i, d) rows

        # j-side invariants hoisted out of the kernel; padded columns give an
        # exactly -inf log-density (=> exp -> 0 in every logsumexp).
        iv = jnp.exp(-logvar)
        pad_j = Bp_j - B
        muT = jnp.pad(mu.T, ((0, 0), (0, pad_j)))
        ivT = jnp.pad(iv.T, ((0, 0), (0, pad_j)))
        muivT = jnp.pad((mu * iv).T, ((0, 0), (0, pad_j)))
        kT = jnp.pad((-0.5 * (logvar + _LOG_2PI)).T, ((0, 0), (0, pad_j)),
                     constant_values=-jnp.inf)
        cj = jnp.pad(jnp.sum(mu * mu * iv + logvar, axis=1)[None, :],
                     ((0, 0), (0, pad_j)), constant_values=jnp.inf)

        kernel = _make_main_kernel(B, D, bi, bj, dataset_size,
                                   prior_mu, prior_sigma)
        stats = pl.pallas_call(
            kernel,
            out_shape=jax.ShapeDtypeStruct((Bp_i, 128), jnp.float32),
            grid_spec=pltpu.PrefetchScalarGridSpec(
                num_scalar_prefetch=0,
                grid=(ni, nj),
                in_specs=[
                    pl.BlockSpec((bi, D), lambda i, j: (i, 0)),      # z   (i)
                    pl.BlockSpec((bi, D), lambda i, j: (i, 0)),      # mu  (i)
                    pl.BlockSpec((bi, D), lambda i, j: (i, 0)),      # lv  (i)
                    pl.BlockSpec((bi * D, 1), lambda i, j: (i, 0)),  # z flat
                    pl.BlockSpec((D, bj), lambda i, j: (0, j)),      # mu^T
                    pl.BlockSpec((D, bj), lambda i, j: (0, j)),      # iv^T
                    pl.BlockSpec((D, bj), lambda i, j: (0, j)),      # -.5(lv+c)^T
                    pl.BlockSpec((D, bj), lambda i, j: (0, j)),      # (mu*iv)^T
                    pl.BlockSpec((1, bj), lambda i, j: (0, j)),      # c_j
                ],
                out_specs=pl.BlockSpec((bi, 128), lambda i, j: (i, 0)),
                scratch_shapes=[
                    pltpu.VMEM((bi, 1), jnp.float32),        # running max, joint
                    pltpu.VMEM((bi, 1), jnp.float32),        # running sum, joint
                    pltpu.VMEM((bi * D, 1), jnp.float32),    # running max, per-dim
                    pltpu.VMEM((bi * D, 1), jnp.float32),    # running sum, per-dim
                ]),
            compiler_params=pltpu.CompilerParams(
                dimension_semantics=("parallel", "arbitrary"),
                vmem_limit_bytes=_VMEM_LIMIT),
        )(z_i, mu_i, lv_i, zf, muT, ivT, kT, muivT, cj)

        stats = stats[:B]
        mi = jnp.mean(stats[:, 0])
        tc = jnp.mean(stats[:, 1])
        dwkl = jnp.mean(stats[:, 2])
        kld = -0.5 * jnp.sum(stats[:, 3]) / float(B * D)

        rec = _mse_mean(x, x0)
        return rec, kld, mi, tc, dwkl

    return loss_fn


def _reference(x, x0, z, mu, logvar, dataset_size,
               prior_mu=0.0, prior_sigma=1.0):
    """Plain-JAX reference (mirrors the PyTorch module, mss=False)."""
    prior_logvar = math.log(prior_sigma ** 2)
    B, D = z.shape

    def ld_fn(s, m, lv):
        t = (s - m) * jnp.exp(-0.5 * lv)
        return -0.5 * (t * t + lv + _LOG_2PI)

    rec = jnp.mean((x0 - x) ** 2)
    kld = -0.5 * jnp.mean(1 + logvar - mu ** 2 - jnp.exp(logvar))
    logqz_given_x = ld_fn(z, mu, logvar).sum(1)
    logpz = ld_fn(z, prior_mu, prior_logvar).sum(1)
    ld = ld_fn(z[:, None, :], mu[None, :, :], logvar[None, :, :])
    log_bn = math.log(B * dataset_size)
    logqz_prodmarg = (jax.scipy.special.logsumexp(ld, axis=1) - log_bn).sum(1)
    logqz = jax.scipy.special.logsumexp(ld.sum(2), axis=1) - log_bn
    mi = jnp.mean(logqz_given_x - logqz)
    tc = jnp.mean(logqz - logqz_prodmarg)
    dwkl = jnp.mean(logqz_prodmarg - logpz)
    return rec, kld, mi, tc, dwkl


if __name__ == "__main__":
    dataset_size = 1000
    batch, input_dim, z_dim = 16, 48, 8

    key = jax.random.PRNGKey(0)
    kx, kx0, kz, kmu, klv = jax.random.split(key, 5)
    x = jax.random.normal(kx, (batch, input_dim), jnp.float32)
    x0 = jax.random.normal(kx0, (batch, input_dim), jnp.float32)
    z = jax.random.normal(kz, (batch, z_dim), jnp.float32)
    mu = jax.random.normal(kmu, (batch, z_dim), jnp.float32)
    logvar = 0.1 * jax.random.normal(klv, (batch, z_dim), jnp.float32)

    loss_fn = make_tcvae_loss(dataset_size)
    out = jax.block_until_ready(loss_fn(x, x0, z, mu, logvar))

    ref = _reference(x, x0, z, mu, logvar, dataset_size)
    names = ("rec", "kld", "mi", "tc", "dwkl")
    for name, got, want in zip(names, out, ref):
        assert np.allclose(np.asarray(got), np.asarray(want),
                           rtol=1e-3, atol=1e-3), (name, got, want)

    print("KERNEL_OK")
</pallas_src>

<mosaic_0001>
module attributes {stable_mosaic.version = 11 : i64} {
  func.func @kernel(%arg0: i32, %arg1: i32, %arg2: memref<8x8xf32, #tpu.memory_space<vmem>>, %arg3: memref<8x8xf32, #tpu.memory_space<vmem>>, %arg4: memref<8x8xf32, #tpu.memory_space<vmem>>, %arg5: memref<64x1xf32, #tpu.memory_space<vmem>>, %arg6: memref<8x128xf32, #tpu.memory_space<vmem>>, %arg7: memref<8x128xf32, #tpu.memory_space<vmem>>, %arg8: memref<8x128xf32, #tpu.memory_space<vmem>>, %arg9: memref<8x128xf32, #tpu.memory_space<vmem>>, %arg10: memref<1x128xf32, #tpu.memory_space<vmem>>, %arg11: memref<8x128xf32, #tpu.memory_space<vmem>>, %arg12: memref<8x1xf32, #tpu.memory_space<vmem>>, %arg13: memref<8x1xf32, #tpu.memory_space<vmem>>, %arg14: memref<64x1xf32, #tpu.memory_space<vmem>>, %arg15: memref<64x1xf32, #tpu.memory_space<vmem>>) attributes {dimension_semantics = [#tpu.dimension_semantics<parallel>, #tpu.dimension_semantics<arbitrary>], iteration_bounds = array<i64: 2, 1>, scalar_prefetch = 0 : i64, scratch_operands = 4 : i64, tpu.core_type = #tpu.core_type<tc>, window_params = [{transform_indices = @transform_0, window_bounds = array<i64: 8, 8>}, {transform_indices = @transform_1, window_bounds = array<i64: 8, 8>}, {transform_indices = @transform_2, window_bounds = array<i64: 8, 8>}, {transform_indices = @transform_3, window_bounds = array<i64: 64, 1>}, {transform_indices = @transform_4, window_bounds = array<i64: 8, 128>}, {transform_indices = @transform_5, window_bounds = array<i64: 8, 128>}, {transform_indices = @transform_6, window_bounds = array<i64: 8, 128>}, {transform_indices = @transform_7, window_bounds = array<i64: 8, 128>}, {transform_indices = @transform_8, window_bounds = array<i64: 1, 128>}, {transform_indices = @transform_9, window_bounds = array<i64: 8, 128>}]} {
    %c0_i32 = arith.constant 0 : i32
    %0 = arith.cmpi eq, %arg1, %c0_i32 : i32
    %1 = arith.extui %0 : i1 to i32
    %c0_i32_0 = arith.constant 0 : i32
    %2 = arith.cmpi ne, %1, %c0_i32_0 : i32
    scf.if %2 {
      %cst_41 = arith.constant -1.000000e+30 : f32
      %73 = vector.broadcast %cst_41 : f32 to vector<8x1xf32>
      %c0_42 = arith.constant 0 : index
      %c0_43 = arith.constant 0 : index
      %74 = vector.load %arg12[%c0_42, %c0_43] : memref<8x1xf32, #tpu.memory_space<vmem>>, vector<8x1xf32>
      tpu.vector_store %arg12[%c0_42, %c0_43], %73 {strides = array<i32>} : memref<8x1xf32, #tpu.memory_space<vmem>>, vector<8x1xf32>,
      %cst_44 = arith.constant 0.000000e+00 : f32
      %75 = vector.broadcast %cst_44 : f32 to vector<8x1xf32>
      %c0_45 = arith.constant 0 : index
      %c0_46 = arith.constant 0 : index
      %76 = vector.load %arg13[%c0_45, %c0_46] : memref<8x1xf32, #tpu.memory_space<vmem>>, vector<8x1xf32>
      tpu.vector_store %arg13[%c0_45, %c0_46], %75 {strides = array<i32>} : memref<8x1xf32, #tpu.memory_space<vmem>>, vector<8x1xf32>,
      %cst_47 = arith.constant -1.000000e+30 : f32
      %77 = vector.broadcast %cst_47 : f32 to vector<64x1xf32>
      %c0_48 = arith.constant 0 : index
      %c0_49 = arith.constant 0 : index
      %78 = vector.load %arg14[%c0_48, %c0_49] : memref<64x1xf32, #tpu.memory_space<vmem>>, vector<64x1xf32>
      tpu.vector_store %arg14[%c0_48, %c0_49], %77 {strides = array<i32>} : memref<64x1xf32, #tpu.memory_space<vmem>>, vector<64x1xf32>,
      %cst_50 = arith.constant 0.000000e+00 : f32
      %79 = vector.broadcast %cst_50 : f32 to vector<64x1xf32>
      %c0_51 = arith.constant 0 : index
      %c0_52 = arith.constant 0 : index
      %80 = vector.load %arg15[%c0_51, %c0_52] : memref<64x1xf32, #tpu.memory_space<vmem>>, vector<64x1xf32>
      tpu.vector_store %arg15[%c0_51, %c0_52], %79 {strides = array<i32>} : memref<64x1xf32, #tpu.memory_space<vmem>>, vector<64x1xf32>,
    } else {
    }
    %c0 = arith.constant 0 : index
    %c0_1 = arith.constant 0 : index
    %3 = vector.load %arg2[%c0, %c0_1] : memref<8x8xf32, #tpu.memory_space<vmem>>, vector<8x8xf32>
    %c0_2 = arith.constant 0 : index
    %c0_3 = arith.constant 0 : index
    %4 = vector.load %arg7[%c0_2, %c0_3] : memref<8x128xf32, #tpu.memory_space<vmem>>, vector<8x128xf32>
    %5 = arith.mulf %3, %3 : vector<8x8xf32>
    %cst = arith.constant dense<0.000000e+00> : vector<8x128xf32>
    %6 = tpu.matmul %5, %4, %cst {dimension_numbers = #tpu.dot_dimension_numbers<[1], [0], [0], [1], [0, 0, 1, 1], [], []>, precision = #tpu.contract_precision<fp32>} : vector<8x8xf32>, vector<8x128xf32>, vector<8x128xf32> -> vector<8x128xf32>
    %c0_4 = arith.constant 0 : index
    %c0_5 = arith.constant 0 : index
    %7 = vector.load %arg9[%c0_4, %c0_5] : memref<8x128xf32, #tpu.memory_space<vmem>>, vector<8x128xf32>
    %cst_6 = arith.constant dense<0.000000e+00> : vector<8x128xf32>
    %8 = tpu.matmul %3, %7, %cst_6 {dimension_numbers = #tpu.dot_dimension_numbers<[1], [0], [0], [1], [0, 0, 1, 1], [], []>, precision = #tpu.contract_precision<fp32>} : vector<8x8xf32>, vector<8x128xf32>, vector<8x128xf32> -> vector<8x128xf32>
    %cst_7 = arith.constant 2.000000e+00 : f32
    %9 = vector.broadcast %cst_7 : f32 to vector<8x128xf32>
    %10 = arith.mulf %9, %8 : vector<8x128xf32>
    %11 = arith.subf %6, %10 : vector<8x128xf32>
    %c0_8 = arith.constant 0 : index
    %c0_9 = arith.constant 0 : index
    %12 = vector.load %arg10[%c0_8, %c0_9] : memref<1x128xf32, #tpu.memory_space<vmem>>, vector<1x128xf32>
    %13 = vector.broadcast %12 : vector<1x128xf32> to vector<8x128xf32>
    %14 = arith.addf %11, %13 : vector<8x128xf32>
    %cst_10 = arith.constant 14.7030163 : f32
    %15 = vector.broadcast %cst_10 : f32 to vector<8x128xf32>
    %16 = arith.addf %14, %15 : vector<8x128xf32>
    %cst_11 = arith.constant -5.000000e-01 : f32
    %17 = vector.broadcast %cst_11 : f32 to vector<8x128xf32>
    %18 = arith.mulf %17, %16 : vector<8x128xf32>
    %c0_12 = arith.constant 0 : index
    %c0_13 = arith.constant 0 : index
    %19 = vector.load %arg12[%c0_12, %c0_13] : memref<8x1xf32, #tpu.memory_space<vmem>>, vector<8x1xf32>
    %cst_14 = arith.constant dense<0xFF800000> : vector<8xf32>
    %20 = vector.multi_reduction <maximumf>, %18, %cst_14 [1] : vector<8x128xf32> to vector<8xf32>
    %21 = vector.shape_cast %20 : vector<8xf32> to vector<8x1xf32>
    %22 = arith.maximumf %19, %21 : vector<8x1xf32>
    %c0_15 = arith.constant 0 : index
    %c0_16 = arith.constant 0 : index
    %23 = vector.load %arg13[%c0_15, %c0_16] : memref<8x1xf32, #tpu.memory_space<vmem>>, vector<8x1xf32>
    %24 = arith.subf %19, %22 : vector<8x1xf32>
    %25 = math.exp %24 : vector<8x1xf32>
    %26 = arith.mulf %23, %25 : vector<8x1xf32>
    %27 = vector.broadcast %22 : vector<8x1xf32> to vector<8x128xf32>
    %28 = arith.subf %18, %27 : vector<8x128xf32>
    %29 = math.exp %28 : vector<8x128xf32>
    %cst_17 = arith.constant dense<0.000000e+00> : vector<8xf32>
    %30 = vector.multi_reduction <add>, %29, %cst_17 [1] : vector<8x128xf32> to vector<8xf32>
    %31 = vector.shape_cast %30 : vector<8xf32> to vector<8x1xf32>
    %32 = arith.addf %26, %31 : vector<8x1xf32>
    %c0_18 = arith.constant 0 : index
    %c0_19 = arith.constant 0 : index
    %33 = vector.load %arg13[%c0_18, %c0_19] : memref<8x1xf32, #tpu.memory_space<vmem>>, vector<8x1xf32>
    tpu.vector_store %arg13[%c0_18, %c0_19], %32 {strides = array<i32>} : memref<8x1xf32, #tpu.memory_space<vmem>>, vector<8x1xf32>,
    %c0_20 = arith.constant 0 : index
    %c0_21 = arith.constant 0 : index
    %34 = vector.load %arg12[%c0_20, %c0_21] : memref<8x1xf32, #tpu.memory_space<vmem>>, vector<8x1xf32>
    tpu.vector_store %arg12[%c0_20, %c0_21], %22 {strides = array<i32>} : memref<8x1xf32, #tpu.memory_space<vmem>>, vector<8x1xf32>,
    %c0_22 = arith.constant 0 : index
    %c0_23 = arith.constant 0 : index
    %35 = vector.load %arg6[%c0_22, %c0_23] : memref<8x128xf32, #tpu.memory_space<vmem>>, vector<8x128xf32>
    %36 = tpu.concatenate %35, %35 in 0 : vector<8x128xf32>, vector<8x128xf32> -> vector<16x128xf32>
    %37 = tpu.concatenate %36, %36 in 0 : vector<16x128xf32>, vector<16x128xf32> -> vector<32x128xf32>
    %38 = tpu.concatenate %37, %37 in 0 : vector<32x128xf32>, vector<32x128xf32> -> vector<64x128xf32>
    %39 = tpu.concatenate %4, %4 in 0 : vector<8x128xf32>, vector<8x128xf32> -> vector<16x128xf32>
    %40 = tpu.concatenate %39, %39 in 0 : vector<16x128xf32>, vector<16x128xf32> -> vector<32x128xf32>
    %41 = tpu.concatenate %40, %40 in 0 : vector<32x128xf32>, vector<32x128xf32> -> vector<64x128xf32>
    %c0_24 = arith.constant 0 : index
    %c0_25 = arith.constant 0 : index
    %42 = vector.load %arg8[%c0_24, %c0_25] : memref<8x128xf32, #tpu.memory_space<vmem>>, vector<8x128xf32>
    %43 = tpu.concatenate %42, %42 in 0 : vector<8x128xf32>, vector<8x128xf32> -> vector<16x128xf32>
    %44 = tpu.concatenate %43, %43 in 0 : vector<16x128xf32>, vector<16x128xf32> -> vector<32x128xf32>
    %45 = tpu.concatenate %44, %44 in 0 : vector<32x128xf32>, vector<32x128xf32> -> vector<64x128xf32>
    %c0_26 = arith.constant 0 : index
    %c0_27 = arith.constant 0 : index
    %46 = vector.load %arg5[%c0_26, %c0_27] : memref<64x1xf32, #tpu.memory_space<vmem>>, vector<64x1xf32>
    %47 = vector.broadcast %46 : vector<64x1xf32> to vector<64x128xf32>
    %48 = arith.subf %47, %38 : vector<64x128xf32>
    %49 = arith.mulf %48, %48 : vector<64x128xf32>
    %cst_28 = arith.constant 5.000000e-01 : f32
    %50 = vector.broadcast %cst_28 : f32 to vector<64x128xf32>
    %51 = arith.mulf %50, %49 : vector<64x128xf32>
    %52 = arith.mulf %51, %41 : vector<64x128xf32>
    %53 = arith.subf %45, %52 : vector<64x128xf32>
    %c0_29 = arith.constant 0 : index
    %c0_30 = arith.constant 0 : index
    %54 = vector.load %arg14[%c0_29, %c0_30] : memref<64x1xf32, #tpu.memory_space<vmem>>, vector<64x1xf32>
    %cst_31 = arith.constant dense<0xFF800000> : vector<64xf32>
    %55 = vector.multi_reduction <maximumf>, %53, %cst_31 [1] : vector<64x128xf32> to vector<64xf32>
    %56 = vector.shape_cast %55 : vector<64xf32> to vector<64x1xf32>
    %57 = arith.maximumf %54, %56 : vector<64x1xf32>
    %c0_32 = arith.constant 0 : index
    %c0_33 = arith.constant 0 : index
    %58 = vector.load %arg15[%c0_32, %c0_33] : memref<64x1xf32, #tpu.memory_space<vmem>>, vector<64x1xf32>
    %59 = arith.subf %54, %57 : vector<64x1xf32>
    %60 = math.exp %59 : vector<64x1xf32>
    %61 = arith.mulf %58, %60 : vector<64x1xf32>
    %62 = vector.broadcast %57 : vector<64x1xf32> to vector<64x128xf32>
    %63 = arith.subf %53, %62 : vector<64x128xf32>
    %64 = math.exp %63 : vector<64x128xf32>
    %cst_34 = arith.constant dense<0.000000e+00> : vector<64xf32>
    %65 = vector.multi_reduction <add>, %64, %cst_34 [1] : vector<64x128xf32> to vector<64xf32>
    %66 = vector.shape_cast %65 : vector<64xf32> to vector<64x1xf32>
    %67 = arith.addf %61, %66 : vector<64x1xf32>
    %c0_35 = arith.constant 0 : index
    %c0_36 = arith.constant 0 : index
    %68 = vector.load %arg15[%c0_35, %c0_36] : memref<64x1xf32, #tpu.memory_space<vmem>>, vector<64x1xf32>
    tpu.vector_store %arg15[%c0_35, %c0_36], %67 {strides = array<i32>} : memref<64x1xf32, #tpu.memory_space<vmem>>, vector<64x1xf32>,
    %c0_37 = arith.constant 0 : index
    %c0_38 = arith.constant 0 : index
    %69 = vector.load %arg14[%c0_37, %c0_38] : memref<64x1xf32, #tpu.memory_space<vmem>>, vector<64x1xf32>
    tpu.vector_store %arg14[%c0_37, %c0_38], %57 {strides = array<i32>} : memref<64x1xf32, #tpu.memory_space<vmem>>, vector<64x1xf32>,
    %c0_i32_39 = arith.constant 0 : i32
    %70 = arith.cmpi eq, %arg1, %c0_i32_39 : i32
    %71 = arith.extui %70 : i1 to i32
    %c0_i32_40 = arith.constant 0 : i32
    %72 = arith.cmpi ne, %71, %c0_i32_40 : i32
    scf.if %72 {
      %c0_41 = arith.constant 0 : index
      %c0_42 = arith.constant 0 : index
      %73 = vector.load %arg12[%c0_41, %c0_42] : memref<8x1xf32, #tpu.memory_space<vmem>>, vector<8x1xf32>
      %c0_43 = arith.constant 0 : index
      %c0_44 = arith.constant 0 : index
      %74 = vector.load %arg13[%c0_43, %c0_44] : memref<8x1xf32, #tpu.memory_space<vmem>>, vector<8x1xf32>
      %75 = math.log %74 : vector<8x1xf32>
      %76 = arith.addf %73, %75 : vector<8x1xf32>
      %cst_45 = arith.constant 9.68034362 : f32
      %77 = vector.broadcast %cst_45 : f32 to vector<8x1xf32>
      %78 = arith.subf %76, %77 : vector<8x1xf32>
      %c0_46 = arith.constant 0 : index
      %c0_47 = arith.constant 0 : index
      %79 = vector.load %arg14[%c0_46, %c0_47] : memref<64x1xf32, #tpu.memory_space<vmem>>, vector<64x1xf32>
      %c0_48 = arith.constant 0 : index
      %c0_49 = arith.constant 0 : index
      %80 = vector.load %arg15[%c0_48, %c0_49] : memref<64x1xf32, #tpu.memory_space<vmem>>, vector<64x1xf32>
      %81 = math.log %80 : vector<64x1xf32>
      %82 = arith.addf %79, %81 : vector<64x1xf32>
      %83 = tpu.iota {dimensions = array<i32: 0>} : vector<8x64xi32>
      %84 = tpu.iota {dimensions = array<i32: 1>} : vector<8x64xi32>
      %c8_i32 = arith.constant 8 : i32
      %85 = vector.broadcast %c8_i32 : i32 to vector<8x64xi32>
      %86 = arith.muli %83, %85 : vector<8x64xi32>
      %87 = arith.cmpi sge, %84, %86 : vector<8x64xi32>
      %c8_i32_50 = arith.constant 8 : i32
      %88 = vector.broadcast %c8_i32_50 : i32 to vector<8x64xi32>
      %89 = arith.muli %83, %88 : vector<8x64xi32>
      %c8_i32_51 = arith.constant 8 : i32
      %90 = vector.broadcast %c8_i32_51 : i32 to vector<8x64xi32>
      %91 = arith.addi %89, %90 : vector<8x64xi32>
      %92 = arith.cmpi slt, %84, %91 : vector<8x64xi32>
      %93 = arith.andi %87, %92 : vector<8x64xi1>
      %cst_52 = arith.constant 1.000000e+00 : f32
      %cst_53 = arith.constant 0.000000e+00 : f32
      %94 = vector.broadcast %cst_52 : f32 to vector<8x64xf32>
      %95 = vector.broadcast %cst_53 : f32 to vector<8x64xf32>
      %96 = arith.select %93, %94, %95 : vector<8x64xi1>, vector<8x64xf32>
      %cst_54 = arith.constant dense<0.000000e+00> : vector<8x1xf32>
      %97 = tpu.matmul %96, %82, %cst_54 {dimension_numbers = #tpu.dot_dimension_numbers<[1], [0], [0], [1], [0, 0, 1, 1], [], []>, precision = #tpu.contract_precision<fp32>} : vector<8x64xf32>, vector<64x1xf32>, vector<8x1xf32> -> vector<8x1xf32>
      %cst_55 = arith.constant 77.442749 : f32
      %98 = vector.broadcast %cst_55 : f32 to vector<8x1xf32>
      %99 = arith.subf %97, %98 : vector<8x1xf32>
      %c0_56 = arith.constant 0 : index
      %c0_57 = arith.constant 0 : index
      %100 = vector.load %arg3[%c0_56, %c0_57] : memref<8x8xf32, #tpu.memory_space<vmem>>, vector<8x8xf32>
      %c0_58 = arith.constant 0 : index
      %c0_59 = arith.constant 0 : index
      %101 = vector.load %arg4[%c0_58, %c0_59] : memref<8x8xf32, #tpu.memory_space<vmem>>, vector<8x8xf32>
      %102 = arith.subf %3, %100 : vector<8x8xf32>
      %cst_60 = arith.constant -5.000000e-01 : f32
      %103 = vector.broadcast %cst_60 : f32 to vector<8x8xf32>
      %104 = arith.mulf %103, %101 : vector<8x8xf32>
      %105 = math.exp %104 : vector<8x8xf32>
      %106 = arith.mulf %102, %105 : vector<8x8xf32>
      %107 = arith.mulf %106, %106 : vector<8x8xf32>
      %108 = arith.addf %107, %101 : vector<8x8xf32>
      %cst_61 = arith.constant 1.83787704 : f32
      %109 = vector.broadcast %cst_61 : f32 to vector<8x8xf32>
      %110 = arith.addf %108, %109 : vector<8x8xf32>
      %cst_62 = arith.constant -5.000000e-01 : f32
      %111 = vector.broadcast %cst_62 : f32 to vector<8x8xf32>
      %112 = arith.mulf %111, %110 : vector<8x8xf32>
      %cst_63 = arith.constant dense<0.000000e+00> : vector<8xf32>
      %113 = vector.multi_reduction <add>, %112, %cst_63 [1] : vector<8x8xf32> to vector<8xf32>
      %114 = vector.shape_cast %113 : vector<8xf32> to vector<8x1xf32>
      %cst_64 = arith.constant 0.000000e+00 : f32
      %115 = vector.broadcast %cst_64 : f32 to vector<8x8xf32>
      %116 = arith.subf %3, %115 : vector<8x8xf32>
      %cst_65 = arith.constant 1.000000e+00 : f32
      %117 = vector.broadcast %cst_65 : f32 to vector<8x8xf32>
      %118 = arith.mulf %116, %117 : vector<8x8xf32>
      %119 = arith.mulf %118, %118 : vector<8x8xf32>
      %cst_66 = arith.constant 0.000000e+00 : f32
      %120 = vector.broadcast %cst_66 : f32 to vector<8x8xf32>
      %121 = arith.addf %119, %120 : vector<8x8xf32>
      %cst_67 = arith.constant 1.83787704 : f32
      %122 = vector.broadcast %cst_67 : f32 to vector<8x8xf32>
      %123 = arith.addf %121, %122 : vector<8x8xf32>
      %cst_68 = arith.constant -5.000000e-01 : f32
      %124 = vector.broadcast %cst_68 : f32 to vector<8x8xf32>
      %125 = arith.mulf %124, %123 : vector<8x8xf32>
      %cst_69 = arith.constant dense<0.000000e+00> : vector<8xf32>
      %126 = vector.multi_reduction <add>, %125, %cst_69 [1] : vector<8x8xf32> to vector<8xf32>
      %127 = vector.shape_cast %126 : vector<8xf32> to vector<8x1xf32>
      %cst_70 = arith.constant 1.000000e+00 : f32
      %128 = vector.broadcast %cst_70 : f32 to vector<8x8xf32>
      %129 = arith.addf %128, %101 : vector<8x8xf32>
      %130 = arith.mulf %100, %100 : vector<8x8xf32>
      %131 = arith.subf %129, %130 : vector<8x8xf32>
      %132 = math.exp %101 : vector<8x8xf32>
      %133 = arith.subf %131, %132 : vector<8x8xf32>
      %cst_71 = arith.constant dense<0.000000e+00> : vector<8xf32>
      %134 = vector.multi_reduction <add>, %133, %cst_71 [1] : vector<8x8xf32> to vector<8xf32>
      %135 = vector.shape_cast %134 : vector<8xf32> to vector<8x1xf32>
      %136 = tpu.iota {dimensions = array<i32: 1>} : vector<8x128xi32>
      %c0_i32_72 = arith.constant 0 : i32
      %137 = vector.broadcast %c0_i32_72 : i32 to vector<8x128xi32>
      %138 = arith.cmpi eq, %136, %137 : vector<8x128xi32>
      %139 = arith.subf %114, %78 : vector<8x1xf32>
      %c1_i32 = arith.constant 1 : i32
      %140 = vector.broadcast %c1_i32 : i32 to vector<8x128xi32>
      %141 = arith.cmpi eq, %136, %140 : vector<8x128xi32>
      %142 = arith.subf %78, %99 : vector<8x1xf32>
      %c2_i32 = arith.constant 2 : i32
      %143 = vector.broadcast %c2_i32 : i32 to vector<8x128xi32>
      %144 = arith.cmpi eq, %136, %143 : vector<8x128xi32>
      %145 = arith.subf %99, %127 : vector<8x1xf32>
      %c3_i32 = arith.constant 3 : i32
      %146 = vector.broadcast %c3_i32 : i32 to vector<8x128xi32>
      %147 = arith.cmpi eq, %136, %146 : vector<8x128xi32>
      %cst_73 = arith.constant 0.000000e+00 : f32
      %148 = vector.shape_cast %135 : vector<8x1xf32> to vector<8x1xf32>
      %149 = vector.broadcast %148 : vector<8x1xf32> to vector<8x128xf32>
      %150 = vector.broadcast %cst_73 : f32 to vector<8x128xf32>
      %151 = arith.select %147, %149, %150 : vector<8x128xi1>, vector<8x128xf32>
      %152 = vector.shape_cast %145 : vector<8x1xf32> to vector<8x1xf32>
      %153 = vector.broadcast %152 : vector<8x1xf32> to vector<8x128xf32>
      %154 = arith.select %144, %153, %151 : vector<8x128xi1>, vector<8x128xf32>
      %155 = vector.shape_cast %142 : vector<8x1xf32> to vector<8x1xf32>
      %156 = vector.broadcast %155 : vector<8x1xf32> to vector<8x128xf32>
      %157 = arith.select %141, %156, %154 : vector<8x128xi1>, vector<8x128xf32>
      %158 = vector.shape_cast %139 : vector<8x1xf32> to vector<8x1xf32>
      %159 = vector.broadcast %158 : vector<8x1xf32> to vector<8x128xf32>
      %160 = arith.select %138, %159, %157 : vector<8x128xi1>, vector<8x128xf32>
      %c0_74 = arith.constant 0 : index
      %c0_75 = arith.constant 0 : index
      %161 = vector.load %arg11[%c0_74, %c0_75] : memref<8x128xf32, #tpu.memory_space<vmem>>, vector<8x128xf32>
      tpu.vector_store %arg11[%c0_74, %c0_75], %160 {strides = array<i32>} : memref<8x128xf32, #tpu.memory_space<vmem>>, vector<8x128xf32>,
    } else {
    }
    return
  }
  func.func @transform_0(%arg0: i32, %arg1: i32) -> (i32, i32) {
    %c0_i32 = arith.constant 0 : i32
    %c0_i32_0 = arith.constant 0 : i32
    return %arg0, %c0_i32 : i32, i32
  }
  func.func @transform_1(%arg0: i32, %arg1: i32) -> (i32, i32) {
    %c0_i32 = arith.constant 0 : i32
    %c0_i32_0 = arith.constant 0 : i32
    return %arg0, %c0_i32 : i32, i32
  }
  func.func @transform_2(%arg0: i32, %arg1: i32) -> (i32, i32) {
    %c0_i32 = arith.constant 0 : i32
    %c0_i32_0 = arith.constant 0 : i32
    return %arg0, %c0_i32 : i32, i32
  }
  func.func @transform_3(%arg0: i32, %arg1: i32) -> (i32, i32) {
    %c0_i32 = arith.constant 0 : i32
    %c0_i32_0 = arith.constant 0 : i32
    return %arg0, %c0_i32 : i32, i32
  }
  func.func @transform_4(%arg0: i32, %arg1: i32) -> (i32, i32) {
    %c0_i32 = arith.constant 0 : i32
    %c0_i32_0 = arith.constant 0 : i32
    return %c0_i32, %arg1 : i32, i32
  }
  func.func @transform_5(%arg0: i32, %arg1: i32) -> (i32, i32) {
    %c0_i32 = arith.constant 0 : i32
    %c0_i32_0 = arith.constant 0 : i32
    return %c0_i32, %arg1 : i32, i32
  }
  func.func @transform_6(%arg0: i32, %arg1: i32) -> (i32, i32) {
    %c0_i32 = arith.constant 0 : i32
    %c0_i32_0 = arith.constant 0 : i32
    return %c0_i32, %arg1 : i32, i32
  }
  func.func @transform_7(%arg0: i32, %arg1: i32) -> (i32, i32) {
    %c0_i32 = arith.constant 0 : i32
    %c0_i32_0 = arith.constant 0 : i32
    return %c0_i32, %arg1 : i32, i32
  }
  func.func @transform_8(%arg0: i32, %arg1: i32) -> (i32, i32) {
    %c0_i32 = arith.constant 0 : i32
    %c0_i32_0 = arith.constant 0 : i32
    return %c0_i32, %arg1 : i32, i32
  }
  func.func @transform_9(%arg0: i32, %arg1: i32) -> (i32, i32) {
    %c0_i32 = arith.constant 0 : i32
    %c0_i32_0 = arith.constant 0 : i32
    return %arg0, %c0_i32 : i32, i32
  }
}

</mosaic_0001>

<bundles_post_ra>
// kernel: tpu_custom_call.1
= control target key start
LH: loop header
LB: loop body
LE: loop exit
PB: predicated region body
PF: predicated region fallthrough
CT: control target
= control target key end

     0   :  { %14 = vsyncpa [#allocation7], 0  ;;  %s2432_s0 = inlined_call_operand.vmem [shape: f32[16,8], index: 0, kind: input, shape index: {}]   ;;  %s2433_s1 = inlined_call_operand.vmem [shape: f32[16,8], index: 1, kind: input, shape index: {}]   ;;  %s2434_s2 = inlined_call_operand.vmem [shape: f32[16,8], index: 2, kind: input, shape index: {}]   ;;  %s2435_s3 = inlined_call_operand.vmem [shape: f32[128,1], index: 3, kind: input, shape index: {}]   ;;  %s2436_s4 = inlined_call_operand.vmem [shape: f32[8,128], index: 4, kind: input, shape index: {}]   ;;  %s2437_s5 = inlined_call_operand.vmem [shape: f32[8,128], index: 5, kind: input, shape index: {}]   ;;  %s2438_s6 = inlined_call_operand.vmem [shape: f32[8,128], index: 6, kind: input, shape index: {}]   ;;  %s2439_s7 = inlined_call_operand.vmem [shape: f32[8,128], index: 7, kind: input, shape index: {}]   ;;  %s2440_s8 = inlined_call_operand.vmem [shape: f32[1,128], index: 8, kind: input, shape index: {}]   ;;  %s2441_s9 = inlined_call_operand.hbm [shape: f32[16,128], index: 9, kind: output, shape index: {}]  }
   0x1   :  { %16 = vsyncpa [#allocation7 + $0x1], 0  ;;  %s1928_s30 = smov 0   ;;  %s1930_s10 = smov 0  }
   0x2   :  { %s1932_s11 = smov 0   ;;  %s1934_s12 = smov 0  }
   0x3   :  { %s1936_s13 = smov 0   ;;  %s1938_s14 = smov 0  }
   0x4 LB: > { %s1650_s15 = sadd.s32 4294967295, %s1873_s14   ;;  %s1651_s16 = sadd.s32 4294967294, %s1873_s14   ;;  %s1873_s14 = sphi %s1938_s14, %s22_s14   ;;  %s1869_s13 = sphi %s1936_s13, %s2450_s13   ;;  %s1865_s12 = sphi %s1934_s12, %s2449_s12   ;;  %s1861_s11 = sphi %s1932_s11, %s2448_s11   ;;  %s1857_s10 = sphi %s1930_s10, %s2447_s10   ;;  %s1853_s30 = sphi %s1928_s30, %s2446_s30  }
   0x5   : > { %s34_s17 = sadd.s32 1, %s1869_s13  ;;  %s275_s18 = sadd.s32 1, %s1861_s11 }
   0x6   : > { %p36_p0 = scmp.ge.s32.totalorder %s34_s17, 2  ;;  %p285_p1 = scmp.ne.s32.totalorder %s1861_s11, %s1857_s10 }
   0x7   : > { %p286_p2 = scmp.eq.s32.totalorder %s1650_s15, 1  ;;  %p291_p3 = scmp.ne.s32.totalorder %s1857_s10, %s1853_s30 }
   0x8   : > { %s2452_s17 = smov (%p36_p0, %s34_s17), 0  ;;  %p292_p5 = scmp.eq.s32.totalorder %s1651_s16, 1 }
   0x9   : > { %p1968_p4 = por %p286_p2, %p285_p1  ;;  %s272_s20 = ssub.s32 %s1869_s13, %s2452_s17 }
   0xa   : > { %p1659_p6 = scmp.ge.s32.totalorder %s1873_s14, 1  ;;  %p273_p7 = scmp.eq.s32.totalorder %s272_s20, 0 }
   0xb   : > { %p1975_p8 = por %p292_p5, %p291_p3  ;;  %p374_p9 = scmp.lt.s32.totalorder %s1873_s14, 3 }
   0xc   : > { %s1981_s22 = scalar_select %p273_p7, %s1861_s11, %s275_s18  }
   0xd   : > { %p375_p10 = pnand %p1659_p6, %p374_p9 }
   0xe   : > { %s1984_s23 = sshll.u32 (!%p375_p10), %s1865_s12, 3  ;;  %p441_p12 = scmp.lt.s32.totalorder (!%p375_p10), %s1865_s12, 1 }
   0xf   : > { %378 = sbr.rel (%p375_p10) target bundleno = 923 (0x39b), region = 56  ;;  %p454_p11 = scmp.lt.s32.totalorder (!%p375_p10), %s1984_s23, 15 }
  0x10   : > { %s1470_s18 = scalar_lea.hbm (!%p375_p10), %s2441_s9, %s1984_s23  ;;  %s1815_s15 = scalar_lea.hbm (!%p375_p10), %s2441_s9, 16 }
  0x14   : > { %v1875_v0 = vmov 0   ;;  %s455_s24 = scalar_select %p454_p11, %s1984_s23, 15  ;;  %v1998_v10 = vld [vmem:[%s2436_s4] sm:$0xff]  ;;  %vm504_vm0 = vcmask 64512   ;;  %vm482_vm1 = vcmask 7168   ;;  %vm1161_vm5 = vcmask 523264  }
  0x15   : > { %1734 = vset.pattern.permute.xlu1 %v1875_v0  ;;  %1733 = vset.pattern.permute.xlu0 %v1875_v0  ;;  %s2454_s12 = smov (!%p441_p12, %s1865_s12), 1  ;;  %v2009_v15 = vld [vmem:[%s2437_s5] sm:$0xff]  ;;  %v1876_v54 = vmov -1e+30  }
  0x16   : > { %1735 = vset.pattern.permute.xlu2 %v1875_v0  ;;  %s1665_s25 = sshll.u32 %s455_s24, 3  ;;  %s1993_s29 = sshll.u32 %s2454_s12, 3  ;;  %v2012_v18 = vand.u32 4294901760, %v2009_v15  ;;  %v654_v20 = vld [vmem:[%s2439_s7] sm:$0xff]  ;;  %492 = vst.msk [vmem:[#allocation4 + $0x38] sm:$0xff] %vm482_vm1, %v1876_v54 }
  0x17   : > { %s457_s28 = scalar_lea.vmem %s2435_s3, %s1665_s25  ;;  %s444_s24 = scalar_lea.vmem %s2432_s0, %s1993_s29  ;;  %v2023_v22 = vand.u32 4294901760, %v654_v20  ;;  %v2032_v27 = vld [vmem:[%s2438_s6] sm:$0xff]  ;;  %483 = vst.msk [vmem:[#allocation2] sm:$0xff] %vm482_vm1, %v1876_v54 }
  0x18   : > { %v845_v1 = vld [vmem:[%s457_s28 + $0x38] sm:$0xff]  ;;  %v843_v2 = vld [vmem:[%s457_s28 + $0x28] sm:$0xff]  ;;  %v844_v4 = vld [vmem:[%s457_s28 + $0x30] sm:$0xff]  ;;  %524 = vmatpush.msra.mxu2 %v2012_v18  ;;  %v550_v26 = vsub.f32 %v2009_v15, %v2012_v18  ;;  %648 = vmatpush.msra.mxu1 %v2012_v18  ;;  %485 = vst.msk [vmem:[#allocation4] sm:$0xff] %vm482_vm1, %v1876_v54  ;;  %s452_s25 = scalar_lea.vmem %s2434_s2, %s1993_s29  ;;  %s448_s27 = scalar_lea.vmem %s2433_s1, %s1993_s29 }
  0x19   : > { %883 = vperm.xlu0 %1733, %v845_v1   ;;  %873 = vperm.xlu1 %1734, %v843_v2   ;;  %v841_v3 = vld [vmem:[%s457_s28 + $0x18] sm:$0xff]  ;;  %v842_v5 = vld [vmem:[%s457_s28 + $0x20] sm:$0xff]  ;;  %v840_v6 = vld [vmem:[%s457_s28 + $0x10] sm:$0xff]  ;;  %v2037_v29 = vsub.f32 %v654_v20, %v2023_v22  ;;  %486 = vst.msk [vmem:[#allocation4 + $0x8] sm:$0xff] %vm482_vm1, %v1876_v54  ;;  %s438_s29 = sand.u32 1, %s1857_s10  }
  0x1a   : > { %863 = vperm.xlu2 %1735, %v841_v3   ;;  %v839_v7 = vld [vmem:[%s457_s28 + $0x8] sm:$0xff]  ;;  %v838_v8 = vld [vmem:[%s457_s28] sm:$0xff]  ;;  %750 = vmatpush.msrb.mxu1 %v2023_v22  ;;  %v551_v34 = vand.u32 4294901760, %v550_v26  ;;  %487 = vst.msk [vmem:[#allocation4 + $0x10] sm:$0xff] %vm482_vm1, %v1876_v54  ;;  %s1660_s28 = sshll.u32 %s438_s29, 3  ;;  %s1460_s23 = scalar_lea.sflag [#allocation7], %s438_s29 }
  0x1b   : > { %v2014_v19 = vld [vmem:[%s444_s24] sm:$0xff]  ;;  %577 = vmatpush.msrb.mxu2 %v550_v26  ;;  %v701_v39 = vand.u32 4294901760, %v2037_v29  ;;  %488 = vst.msk [vmem:[#allocation4 + $0x18] sm:$0xff] %vm482_vm1, %v1876_v54  ;;  %s440_s20 = scalar_lea.vmem [#allocation6], %s1660_s28 }
  0x1c   : > { %v2021_v21 = vmul.f32 %v2014_v19, %v2014_v19  ;;  %v656_v30 = vsel %vm504_vm0, %v2014_v19, 0  ;;  %626 = vmatpush.msra.mxu0 %v551_v34  ;;  %v552_v45 = vsub.f32 %v550_v26, %v551_v34  ;;  %489 = vst.msk [vmem:[#allocation4 + $0x20] sm:$0xff] %vm482_vm1, %v1876_v54  ;;  %s1472_s24 = sshll.u32 %s440_s20, 4  ;;  %s1473_s24 = int_to_ptr.vmem [resolvable:$true] %s1472_s24 }
  0x1d   : > { %v2057_v46 = vand.u32 4294901760, %v656_v30  ;;  %v702_v47 = vsub.f32 %v2037_v29, %v701_v39  ;;  %490 = vst.msk [vmem:[#allocation4 + $0x28] sm:$0xff] %vm482_vm1, %v1876_v54 }
  0x1e   : > { %v506_v28 = vsel %vm504_vm0, %v2021_v21, 0  ;;  %v553_v53 = vand.u32 4294901760, %v552_v45  ;;  %727 = vmatpush.msrb.mxu0 %v2037_v29  ;;  %491 = vst.msk [vmem:[#allocation4 + $0x30] sm:$0xff] %vm482_vm1, %v1876_v54 }
  0x1f   : > { %v525_v33 = vand.u32 4294901760, %v506_v28  ;;  %v703_v57 = vand.u32 4294901760, %v702_v47  ;;  %v676_v59 = vsub.f32 %v656_v30, %v2057_v46 }
  0x20   : > { %554 = vmatpush.msra.mxu3 %v553_v53  ;;  %v2180_v45 = vld [vmem:[#allocation4 + $0x8] sm:$0xff] }
  0x21   : > { %878 = vperm.xlu0 %1733, %v844_v4   ;;  %868 = vperm.xlu1 %1734, %v842_v5   ;;  %v2055_v44 = vsub.f32 %v506_v28, %v525_v33 }
  0x22   : > { %858 = vperm.xlu2 %1735, %v840_v6   ;;  %628 = vmatmul.f32.vlgmr.msra.gmra.mxu0 %v525_v33 }
  0x23   : > { %650 = vmatmul.f32.vlgmr.msra.gmra.mxu1 %v525_v33  ;;  %v527_v52 = vand.u32 4294901760, %v2055_v44  ;;  %556 = vmatmul.f32.vlgmr.msra.gmra.mxu3 %v525_v33  ;;  %v2156_v33 = vld [vmem:[#allocation4 + $0x20] sm:$0xff] }
  0x24   : > { %600 = vmatpush.msrb.mxu3 %v2012_v18  ;;  %v2138_v26 = vld [vmem:[#allocation4 + $0x28] sm:$0xff] }
  0x25   : > { %v528_v58 = vsub.f32 %v2055_v44, %v527_v52  ;;  %v2158_v34 = vld [vmem:[#allocation4 + $0x30] sm:$0xff] }
  0x26   : > { %704 = vmatpush.msra.mxu3 %v703_v57 }
  0x27   : > { %v529_v2 = vand.u32 4294901760, %v528_v58 }
  0x29   : > { %853 = vperm.xlu0 %1733, %v839_v7   ;;  %848 = vperm.xlu1 %1734, %v838_v8   ;;  %v677_v7 = vand.u32 4294901760, %v676_v59 }
  0x2a   : > { %530 = vmatmul.f32.vlgmr.msra.gmra.mxu2 %v529_v2  ;;  %730 = vmatmul.f32.vlgmr.msrb.gmra.mxu0 %v676_v59 }
  0x2b   : > { %674 = vmatpush.msra.mxu2 %v2023_v22  ;;  %754 = vmatmul.f32.vlgmr.msrb.gmra.mxu1 %v677_v7  ;;  %v678_v20 = vsub.f32 %v676_v59, %v677_v7 }
  0x2c   : > { %604 = vmatmul.f32.vlgmr.msrb.gmra.mxu3 %v527_v52 }
  0x2d   : > { %798 = vmatpush.msrb.mxu3 %v2023_v22 }
  0x32   : > { %580 = vmatmul.f32.vlgmr.msrb.gmra.mxu2 %v2055_v44  ;;  %v2178_v44 = vld [vmem:[#allocation4 + $0x10] sm:$0xff] }
  0x33   : > { %776 = vmatpush.msrb.mxu2 %v701_v39 }
  0x34   : > { %706 = vmatmul.f32.vlgmr.msra.gmra.mxu3 %v2057_v46 }
  0x3c   : > { %800 = vmatmul.f32.vlgmr.msrb.gmra.mxu3 %v2057_v46 }
  0x74   : > { %v864_v9 = vpop.permute.xlu2 %863 }
  0x75   : > { %v889_v35 = vsub.f32 %v864_v9, %v1998_v10 }
  0x77   : > { %v897_v50 = vmul.f32 %v889_v35, %v889_v35 }
  0x79   : > { %v905_v62 = vmul.f32 0.5, %v897_v50 }
  0x7c   : > { %v859_v25 = vpop.permute.xlu2 %858 }
  0x7d   : > { %v888_v38 = vsub.f32 %v859_v25, %v1998_v10  ;;  %v1877_v25 = vmov 0.0  }
  0x7e   : > { %498 = vst.msk [vmem:[#allocation5 + $0x28] sm:$0xff] %vm482_vm1, %v1877_v25 }
  0x7f   : > { %v896_v51 = vmul.f32 %v888_v38, %v888_v38  ;;  %484 = vst.msk [vmem:[#allocation3] sm:$0xff] %vm482_vm1, %v1877_v25 }
  0x80   : > { %493 = vst.msk [vmem:[#allocation5] sm:$0xff] %vm482_vm1, %v1877_v25 }
  0x81   : > { %v904_v63 = vmul.f32 0.5, %v896_v51  ;;  %494 = vst.msk [vmem:[#allocation5 + $0x8] sm:$0xff] %vm482_vm1, %v1877_v25 }
  0x82   : > { %495 = vst.msk [vmem:[#allocation5 + $0x10] sm:$0xff] %vm482_vm1, %v1877_v25 }
  0x83   : > { %496 = vst.msk [vmem:[#allocation5 + $0x18] sm:$0xff] %vm482_vm1, %v1877_v25 }
  0x84   : > { %497 = vst.msk [vmem:[#allocation5 + $0x20] sm:$0xff] %vm482_vm1, %v1877_v25 }
  0x85   : > { %499 = vst.msk [vmem:[#allocation5 + $0x30] sm:$0xff] %vm482_vm1, %v1877_v25 }
  0x86   : > { %500 = vst.msk [vmem:[#allocation5 + $0x38] sm:$0xff] %vm482_vm1, %v1877_v25 }
  0x8b   : > { %v884_v11 = vpop.permute.xlu0 %883  ;;  %v874_v12 = vpop.permute.xlu1 %873 }
  0x8c   : > { %v893_v13 = vsub.f32 %v884_v11, %v1998_v10  ;;  %v891_v14 = vsub.f32 %v874_v12, %v1998_v10  ;;  %v913_v11 = vmul.f32 %v905_v62, %v2009_v15  ;;  %v912_v12 = vmul.f32 %v904_v63, %v2009_v15 }
  0x8e   : > { %v901_v16 = vmul.f32 %v893_v13, %v893_v13  ;;  %v899_v17 = vmul.f32 %v891_v14, %v891_v14 }
  0x90   : > { %v909_v23 = vmul.f32 0.5, %v901_v16  ;;  %v907_v24 = vmul.f32 0.5, %v899_v17  ;;  %v2096_v16 = vsub.f32 %v2032_v27, %v913_v11  ;;  %v2099_v17 = vsub.f32 %v2032_v27, %v912_v12 }
  0x92   : > { %v917_v31 = vmul.f32 %v909_v23, %v2009_v15  ;;  %v915_v32 = vmul.f32 %v907_v24, %v2009_v15  ;;  %v679_v23 = vand.u32 4294901760, %v678_v20 }
  0x93   : > { %v879_v36 = vpop.permute.xlu0 %878  ;;  %v869_v37 = vpop.permute.xlu1 %868 }
  0x94   : > { %v892_v40 = vsub.f32 %v879_v36, %v1998_v10  ;;  %v890_v41 = vsub.f32 %v869_v37, %v1998_v10  ;;  %v2050_v42 = vsub.f32 %v2032_v27, %v917_v31  ;;  %v2053_v43 = vsub.f32 %v2032_v27, %v915_v32  ;;  %680 = vmatmul.f32.vlgmr.msra.gmra.mxu2 %v679_v23 }
  0x96   : > { %v900_v48 = vmul.f32 %v892_v40, %v892_v40  ;;  %v898_v49 = vmul.f32 %v890_v41, %v890_v41  ;;  %948 = vmax.xlane.f32.xlu2 %v2050_v42  ;;  %944 = vmax.xlane.f32.xlu1 %v2053_v43  ;;  %v2176_v41 = vld [vmem:[#allocation4 + $0x18] sm:$0xff] }
  0x98   : > { %v908_v55 = vmul.f32 0.5, %v900_v48  ;;  %v906_v56 = vmul.f32 0.5, %v898_v49 }
  0x9a   : > { %v914_v60 = vmul.f32 %v906_v56, %v2009_v15  ;;  %v916_v61 = vmul.f32 %v908_v55, %v2009_v15  ;;  %v2206_v55 = vld [vmem:[#allocation4] sm:$0xff] }
  0x9b   : > { %v854_v0 = vpop.permute.xlu0 %853  ;;  %v849_v1 = vpop.permute.xlu1 %848 }
  0x9c   : > { %v887_v3 = vsub.f32 %v854_v0, %v1998_v10  ;;  %v886_v4 = vsub.f32 %v849_v1, %v1998_v10  ;;  %v2079_v5 = vsub.f32 %v2032_v27, %v914_v60  ;;  %v2082_v6 = vsub.f32 %v2032_v27, %v916_v61  ;;  %778 = vmatmul.f32.vlgmr.msrb.gmra.mxu2 %v2057_v46 }
  0x9e   : > { %v895_v8 = vmul.f32 %v887_v3, %v887_v3  ;;  %942 = vmax.xlane.f32.xlu2 %v2079_v5  ;;  %946 = vmax.xlane.f32.xlu0 %v2082_v6  ;;  %v894_v10 = vmul.f32 %v886_v4, %v886_v4 }
  0x9f   : > { %v629_v3 = vpop.f32.mrf.mxu0 }
  0xa0   : > { %v903_v9 = vmul.f32 0.5, %v895_v8  ;;  %v902_v14 = vmul.f32 0.5, %v894_v10  ;;  %v651_v4 = vpop.f32.mrf.mxu1 }
  0xa2   : > { %v911_v13 = vmul.f32 %v903_v9, %v2009_v15  ;;  %v910_v22 = vmul.f32 %v902_v14, %v2009_v15  ;;  %v2136_v15 = vld [vmem:[#allocation4 + $0x38] sm:$0xff] }
  0xa4   : > { %v2102_v18 = vsub.f32 %v2032_v27, %v911_v13  ;;  %v2113_v24 = vsub.f32 %v2032_v27, %v910_v22 }
  0xa6   : > { %940 = vmax.xlane.f32.xlu2 %v2096_v16  ;;  %938 = vmax.xlane.f32.xlu0 %v2099_v17  ;;  %v557_v59 = vpop.f32.mrf.mxu3 }
  0xa7   : > { %936 = vmax.xlane.f32.xlu1 %v2102_v18  ;;  %v731_v10 = vpop.f32.mrf.mxu0 }
  0xa8   : > { %v755_v20 = vpop.f32.mrf.mxu1 }
  0xad   : > { %v531_v62 = vpop.f32.mrf.mxu2 }
  0xae   : > { %934 = vmax.xlane.f32.xlu2 %v2113_v24  ;;  %v558_v13 = vadd.f32 %v557_v59, %v531_v62 }
  0xaf   : > { %v605_v0 = vpop.f32.mrf.mxu3 }
  0xb5   : > { %v581_v2 = vpop.f32.mrf.mxu2 }
  0xb6   : > { %v582_v22 = vadd.f32 %v581_v2, %v558_v13 }
  0xb7   : > { %v707_v7 = vpop.f32.mrf.mxu3 }
 0x109   : > { %v949_v27 = vpop.xlane.xlu2 %948  ;;  %v945_v28 = vpop.xlane.xlu1 %944 }
 0x10a   : > { %v2141_v29 = vmax.f32 %v2136_v15, %v949_v27  ;;  %v2144_v30 = vmax.f32 %v2138_v26, %v945_v28 }
 0x10c   : > { %v973_v31 = vsub.f32 %v2136_v15, %v2141_v29  ;;  %1101 = vst.msk [vmem:[#allocation4 + $0x38] sm:$0xff] %vm482_vm1, %v2141_v29  ;;  %v971_v32 = vsub.f32 %v2138_v26, %v2144_v30  ;;  %1035 = vperm.xlu0 %1733, %v2141_v29   ;;  %1025 = vperm.xlu2 %1735, %v2144_v30  }
 0x10d   : > { %1099 = vst.msk [vmem:[#allocation4 + $0x28] sm:$0xff] %vm482_vm1, %v2144_v30 }
 0x111   : > { %v943_v35 = vpop.xlane.xlu2 %942  ;;  %v947_v36 = vpop.xlane.xlu0 %946 }
 0x112   : > { %v2161_v37 = vmax.f32 %v2156_v33, %v943_v35  ;;  %v2164_v38 = vmax.f32 %v2158_v34, %v947_v36 }
 0x114   : > { %v970_v39 = vsub.f32 %v2156_v33, %v2161_v37  ;;  %1098 = vst.msk [vmem:[#allocation4 + $0x20] sm:$0xff] %vm482_vm1, %v2161_v37  ;;  %v972_v40 = vsub.f32 %v2158_v34, %v2164_v38  ;;  %1020 = vperm.xlu0 %1733, %v2161_v37   ;;  %1030 = vperm.xlu1 %1734, %v2164_v38   ;;  %v962_v37 = vld [vmem:[#allocation5 + $0x20] sm:$0xff] }
 0x115   : > { %1100 = vst.msk [vmem:[#allocation4 + $0x30] sm:$0xff] %vm482_vm1, %v2164_v38 }
 0x116   : > { %v986_v26 = vmul.f32 1.442695, %v972_v40  ;;  %v964_v40 = vld [vmem:[#allocation5 + $0x30] sm:$0xff] }
 0x117   : > { %v681_v8 = vpop.f32.mrf.mxu2 }
 0x118   : > { %v708_v9 = vadd.f32 %v707_v7, %v681_v8 }
 0x119   : > { %v941_v46 = vpop.xlane.xlu2 %940  ;;  %v939_v47 = vpop.xlane.xlu0 %938 }
 0x11a   : > { %v2183_v48 = vmax.f32 %v2176_v41, %v941_v46  ;;  %v2186_v49 = vmax.f32 %v2178_v44, %v939_v47  ;;  %v937_v50 = vpop.xlane.xlu1 %936  ;;  %v732_v14 = vadd.f32 %v731_v10, %v708_v9 }
 0x11b   : > { %v2189_v51 = vmax.f32 %v2180_v45, %v937_v50  ;;  %v606_v50 = vadd.f32 %v605_v0, %v582_v22 }
 0x11c   : > { %v969_v52 = vsub.f32 %v2176_v41, %v2183_v48  ;;  %1097 = vst.msk [vmem:[#allocation4 + $0x18] sm:$0xff] %vm482_vm1, %v2183_v48  ;;  %v968_v53 = vsub.f32 %v2178_v44, %v2186_v49  ;;  %1010 = vperm.xlu0 %1733, %v2186_v49   ;;  %1015 = vperm.xlu1 %1734, %v2183_v48  }
 0x11d   : > { %1096 = vst.msk [vmem:[#allocation4 + $0x10] sm:$0xff] %vm482_vm1, %v2186_v49  ;;  %v967_v54 = vsub.f32 %v2180_v45, %v2189_v51  ;;  %1005 = vperm.xlu2 %1735, %v2189_v51   ;;  %v756_v23 = vadd.f32 %v755_v20, %v732_v14 }
 0x11e   : > { %1095 = vst.msk [vmem:[#allocation4 + $0x8] sm:$0xff] %vm482_vm1, %v2189_v51  ;;  %v978_v29 = vmul.f32 1.442695, %v968_v53 }
 0x11f   : > { %v779_v27 = vpop.f32.mrf.mxu2  ;;  %v976_v33 = vmul.f32 1.442695, %v967_v54 }
 0x121   : > { %v935_v56 = vpop.xlane.xlu2 %934 }
 0x122   : > { %v2209_v57 = vmax.f32 %v2206_v55, %v935_v56  ;;  %v780_v56 = vadd.f32 %v779_v27, %v756_v23 }
 0x124   : > { %v966_v58 = vsub.f32 %v2206_v55, %v2209_v57  ;;  %1094 = vst.msk [vmem:[#allocation4] sm:$0xff] %vm482_vm1, %v2209_v57  ;;  %1000 = vperm.xlu1 %1734, %v2209_v57  }
 0x126   : > { %v974_v54 = vmul.f32 1.442695, %v966_v58 }
 0x166   : > { %v1026_v60 = vpop.permute.xlu2 %1025 }
 0x167   : > { %v1043_v61 = vsub.f32 %v2053_v43, %v1026_v60 }
 0x169   : > { %v1056_v63 = vmul.f32 1.442695, %v1043_v61  ;;  %v801_v61 = vpop.f32.mrf.mxu3 }
 0x16b   : > { %1737 = vpow2.f32 %v1056_v63  ;;  %v630_v63 = vadd.f32 %v629_v3, %v606_v50  ;;  %v1736_v3 = vld [vmem:[%s2440_s8] ss:$0 sm:$0xff] }
 0x16d   : > { %v652_v0 = vadd.f32 %v651_v4, %v630_v63  ;;  %v959_v63 = vld [vmem:[#allocation5 + $0x8] sm:$0xff] }
 0x171   : > { %v1738_v1 = vpop.eup %1737 }
 0x172   : > { %1072 = vadd.xlane.f32.xlu1 %v1738_v1  ;;  %v802_v1 = vadd.f32 %v801_v61, %v780_v56  ;;  %v988_v56 = vmul.f32 1.442695, %v973_v31 }
 0x174   : > { %v804_v9 = vmul.f32 2.0, %v802_v1  ;;  %v960_v1 = vld [vmem:[#allocation5 + $0x10] sm:$0xff] }
 0x177   : > { %v1006_v36 = vpop.permute.xlu2 %1005 }
 0x178   : > { %v1039_v62 = vsub.f32 %v2102_v18, %v1006_v36  ;;  %v805_v18 = vsub.f32 %v652_v0, %v804_v9  ;;  %v963_v36 = vld [vmem:[#allocation5 + $0x28] sm:$0xff] }
 0x17a   : > { %v1048_v2 = vmul.f32 1.442695, %v1039_v62  ;;  %v810_v4 = vadd.f32 %v1736_v3, %v805_v18 }
 0x17c   : > { %v811_v23 = vadd.f32 14.703016, %v810_v4 }
 0x17e   : > { %v1036_v11 = vpop.permute.xlu0 %1035  ;;  %v2227_v27 = vmul.f32 -0.5, %v811_v23 }
 0x17f   : > { %v1045_v12 = vsub.f32 %v2050_v42, %v1036_v11 }
 0x181   : > { %v1060_v43 = vmul.f32 1.442695, %v1045_v12 }
 0x183   : > { %1739 = vpow2.f32 %v1060_v43 }
 0x186   : > { %v1021_v28 = vpop.permute.xlu0 %1020  ;;  %v1031_v35 = vpop.permute.xlu1 %1030 }
 0x187   : > { %v1042_v46 = vsub.f32 %v2079_v5, %v1021_v28  ;;  %v1044_v47 = vsub.f32 %v2082_v6, %v1031_v35 }
 0x189   : > { %v1740_v60 = vpop.eup %1739  ;;  %v1054_v42 = vmul.f32 1.442695, %v1042_v46  ;;  %v1058_v59 = vmul.f32 1.442695, %v1044_v47 }
 0x18a   : > { %1076 = vadd.xlane.f32.xlu0 %v1740_v60  ;;  %v982_v60 = vmul.f32 1.442695, %v970_v39 }
 0x18b   : > { %1741 = vpow2.f32 %v1054_v42  ;;  %v980_v42 = vmul.f32 1.442695, %v969_v52 }
 0x18c   : > { %1743 = vpow2.f32 %v1058_v59 }
 0x18d   : > { %1745 = vpow2.f32 %v1048_v2  ;;  %v1151_v2 = vlaneseq }
 0x18e   : > { %v1011_v7 = vpop.permute.xlu0 %1010  ;;  %v1016_v8 = vpop.permute.xlu1 %1015 }
 0x18f   : > { %v1040_v5 = vsub.f32 %v2099_v17, %v1011_v7  ;;  %v1041_v6 = vsub.f32 %v2096_v16, %v1016_v8  ;;  %v961_v8 = vld [vmem:[#allocation5 + $0x18] sm:$0xff] }
 0x191   : > { %v1742_v10 = vpop.eup %1741  ;;  %v1050_v11 = vmul.f32 1.442695, %v1040_v5  ;;  %v1052_v12 = vmul.f32 1.442695, %v1041_v6  ;;  %v1152_v5 = vshrl.u32 %v1151_v2, 7 }
 0x192   : > { %v1744_v13 = vpop.eup %1743  ;;  %1070 = vadd.xlane.f32.xlu0 %v1742_v10 }
 0x193   : > { %1747 = vpow2.f32 %v1050_v11  ;;  %1074 = vadd.xlane.f32.xlu2 %v1744_v13  ;;  %v1746_v16 = vpop.eup %1745  ;;  %v1155_v18 = vmul.u32 8, %v1152_v5 }
 0x194   : > { %1749 = vpow2.f32 %v1052_v12 }
 0x196   : > { %v1001_v14 = vpop.permute.xlu1 %1000 }
 0x197   : > { %v1038_v17 = vsub.f32 %v2113_v24, %v1001_v14  ;;  %v984_v24 = vmul.f32 1.442695, %v971_v32  ;;  %v965_v32 = vld [vmem:[#allocation5 + $0x38] sm:$0xff] }
 0x199   : > { %v1748_v20 = vpop.eup %1747  ;;  %v1046_v43 = vmul.f32 1.442695, %v1038_v17 }
 0x19a   : > { %v1750_v22 = vpop.eup %1749  ;;  %1066 = vadd.xlane.f32.xlu1 %v1748_v20  ;;  %1064 = vadd.xlane.f32.xlu0 %v1746_v16  ;;  %v1118_v16 = vld [vmem:[#allocation4 + $0x38] sm:$0xff]  ;;  %v1116_v20 = vld [vmem:[#allocation4 + $0x28] sm:$0xff] }
 0x19b   : > { %1751 = vpow2.f32 %v1046_v43  ;;  %1068 = vadd.xlane.f32.xlu2 %v1750_v22 }
 0x19c   : > { %1753 = vpow2.f32 %v984_v24  ;;  %v2261_v24 = vand.u32 127, %v1151_v2 }
 0x19d   : > { %1755 = vpow2.f32 %v988_v56 }
 0x19e   : > { %1757 = vpow2.f32 %v982_v60  ;;  %vm2278_vm2 = vcmp.ge.s32.totalorder %v2261_v24, %v1155_v18  ;;  %vm1438_vm6 = vcmp.eq.s32.totalorder %v2261_v24, 3  ;;  %vm1436_vm7 = vcmp.eq.s32.totalorder %v2261_v24, 2 }
 0x19f   : > { %1759 = vpow2.f32 %v986_v26  ;;  %vm1434_vm8 = vcmp.eq.s32.totalorder %v2261_v24, 1  ;;  %vm1432_vm9 = vcmp.eq.s32.totalorder %v2261_v24, 0 }
 0x1a0   : > { %1761 = vpow2.f32 %v980_v42 }
 0x1a1   : > { %v1752_v28 = vpop.eup %1751  ;;  %1763 = vpow2.f32 %v978_v29 }
 0x1a2   : > { %814 = vmax.xlane.f32.xlu1 %v2227_v27  ;;  %v1754_v35 = vpop.eup %1753  ;;  %1765 = vpow2.f32 %v976_v33 }
 0x1a3   : > { %1062 = vadd.xlane.f32.xlu2 %v1752_v28  ;;  %v995_v46 = vmul.f32 %v1754_v35, %v963_v36  ;;  %v1756_v30 = vpop.eup %1755  ;;  %v958_v28 = vld [vmem:[#allocation5] sm:$0xff]  ;;  %v1157_v35 = vadd.s32 8, %v1155_v18  ;;  %v1113_v18 = vld [vmem:[#allocation4 + $0x10] sm:$0xff] }
 0x1a4   : > { %v997_v61 = vmul.f32 %v1756_v30, %v965_v32  ;;  %v1758_v34 = vpop.eup %1757 }
 0x1a5   : > { %v1760_v39 = vpop.eup %1759  ;;  %v994_v41 = vmul.f32 %v1758_v34, %v962_v37  ;;  %vm1158_vm3 = vcmp.lt.s32.totalorder %v2261_v24, %v1157_v35 }
 0x1a6   : > { %v996_v44 = vmul.f32 %v1760_v39, %v964_v40  ;;  %v1762_v53 = vpop.eup %1761  ;;  %v1117_v40 = vld [vmem:[#allocation4 + $0x30] sm:$0xff]  ;;  %vm1159_vm4 = vmand %vm2278_vm2, %vm1158_vm3 }
 0x1a7   : > { %v1764_v51 = vpop.eup %1763  ;;  %v993_v10 = vmul.f32 %v1762_v53, %v961_v8 }
 0x1a8   : > { %v1766_v62 = vpop.eup %1765  ;;  %v992_v0 = vmul.f32 %v1764_v51, %v960_v1  ;;  %v2306_v51 = vsel %vm1159_vm4, 1.0, %v1877_v25 }
 0x1a9   : > { %v991_v6 = vmul.f32 %v1766_v62, %v959_v63  ;;  %v1163_v8 = vsel %vm1161_vm5, %v2306_v51, 0 }
 0x1e5   : > { %v1073_v47 = vpop.xlane.xlu1 %1072 }
 0x1e6   : > { %v1083_v50 = vadd.f32 %v1073_v47, %v995_v46  ;;  %v2265_v46 = vld [vmem:[#allocation2] sm:$0xff] }
 0x1e8   : > { %1091 = vst.msk [vmem:[#allocation5 + $0x28] sm:$0xff] %vm482_vm1, %v1083_v50 }
 0x1ef   : > { %v1124_v38 = vld [vmem:[#allocation5 + $0x28] sm:$0xff] }
 0x1f0   : > { %1767 = vlog2.f32 %v1124_v38  ;;  %v1115_v38 = vld [vmem:[#allocation4 + $0x20] sm:$0xff] }
 0x1f6   : > { %v1768_v7 = vpop.eup %1767 }
 0x1f7   : > { %v1138_v55 = vmul.f32 0.6931472, %v1768_v7 }
 0x1f9   : > { %v1148_v22 = vadd.f32 %v1138_v55, %v1116_v20 }
 0x1fb   : > { %v2272_v60 = vand.u32 4294901760, %v1148_v22 }
 0x1fd   : > { %v1077_v15 = vpop.xlane.xlu0 %1076 }
 0x1fe   : > { %v1085_v31 = vadd.f32 %v1077_v15, %v997_v61 }
 0x200   : > { %1093 = vst.msk [vmem:[#allocation5 + $0x38] sm:$0xff] %vm482_vm1, %v1085_v31 }
 0x205   : > { %v1071_v48 = vpop.xlane.xlu0 %1070 }
 0x206   : > { %v1082_v49 = vadd.f32 %v1071_v48, %v994_v41  ;;  %v1075_v52 = vpop.xlane.xlu2 %1074 }
 0x207   : > { %v1084_v59 = vadd.f32 %v1075_v52, %v996_v44  ;;  %v1126_v45 = vld [vmem:[#allocation5 + $0x38] sm:$0xff]  ;;  %v2295_v44 = vsub.f32 %v1148_v22, %v2272_v60 }
 0x208   : > { %1090 = vst.msk [vmem:[#allocation5 + $0x20] sm:$0xff] %vm482_vm1, %v1082_v49  ;;  %1769 = vlog2.f32 %v1126_v45 }
 0x209   : > { %1092 = vst.msk [vmem:[#allocation5 + $0x30] sm:$0xff] %vm482_vm1, %v1084_v59  ;;  %1771 = vpow2.f32 %v974_v54  ;;  %v1220_v62 = vand.u32 4294901760, %v2295_v44 }
 0x20d   : > { %v1065_v9 = vpop.xlane.xlu0 %1064  ;;  %v1067_v11 = vpop.xlane.xlu1 %1066 }
 0x20e   : > { %v1770_v57 = vpop.eup %1769  ;;  %v1079_v58 = vadd.f32 %v1065_v9, %v991_v6  ;;  %v1069_v12 = vpop.xlane.xlu2 %1068  ;;  %v1080_v13 = vadd.f32 %v1067_v11, %v992_v0  ;;  %v1112_v9 = vld [vmem:[#allocation4 + $0x8] sm:$0xff]  ;;  %v1114_v11 = vld [vmem:[#allocation4 + $0x18] sm:$0xff] }
 0x20f   : > { %v1081_v3 = vadd.f32 %v1069_v12, %v993_v10  ;;  %v1142_v14 = vmul.f32 0.6931472, %v1770_v57  ;;  %v1123_v17 = vld [vmem:[#allocation5 + $0x20] sm:$0xff]  ;;  %v1772_v23 = vpop.eup %1771  ;;  %v1221_v57 = vsub.f32 %v2295_v44, %v1220_v62 }
 0x210   : > { %1087 = vst.msk [vmem:[#allocation5 + $0x8] sm:$0xff] %vm482_vm1, %v1079_v58  ;;  %v1125_v4 = vld [vmem:[#allocation5 + $0x30] sm:$0xff]  ;;  %1773 = vlog2.f32 %v1123_v17  ;;  %v990_v47 = vmul.f32 %v1772_v23, %v958_v28 }
 0x211   : > { %1089 = vst.msk [vmem:[#allocation5 + $0x18] sm:$0xff] %vm482_vm1, %v1081_v3  ;;  %v1150_v43 = vadd.f32 %v1142_v14, %v1118_v16  ;;  %1775 = vlog2.f32 %v1125_v4  ;;  %v1190_v3 = vsub.f32 %v1163_v8, %v1163_v8  ;;  %v1222_v23 = vand.u32 4294901760, %v1221_v57 }
 0x212   : > { %1088 = vst.msk [vmem:[#allocation5 + $0x10] sm:$0xff] %vm482_vm1, %v1080_v13 }
 0x213   : > { %v2263_v36 = vand.u32 4294901760, %v1150_v43  ;;  %v1191_v35 = vand.u32 4294901760, %v1190_v3 }
 0x215   : > { %1174 = vmatpush.msra.mxu0 %v2263_v36  ;;  %1306 = vmatpush.msra.mxu3 %v2263_v36  ;;  %v815_v50 = vpop.xlane.xlu1 %814  ;;  %v2270_v56 = vsub.f32 %v1150_v43, %v2263_v36 }
 0x216   : > { %v1774_v26 = vpop.eup %1773  ;;  %v1063_v30 = vpop.xlane.xlu2 %1062  ;;  %v2275_v32 = vmax.f32 %v2265_v46, %v815_v50 }
 0x217   : > { %v1776_v42 = vpop.eup %1775  ;;  %v1078_v15 = vadd.f32 %v1063_v30, %v990_v47  ;;  %1269 = vmatpush.msra.mxu2 %v2270_v56  ;;  %v1208_v29 = vand.u32 4294901760, %v2270_v56  ;;  %v1136_v31 = vmul.f32 0.6931472, %v1774_v26  ;;  %v1120_v33 = vld [vmem:[#allocation5 + $0x8] sm:$0xff]  ;;  %v1418_v47 = vadd.f32 1.837877, %v2021_v21 }
 0x218   : > { %v818_v34 = vsub.f32 %v2265_v46, %v2275_v32  ;;  %835 = vst.msk [vmem:[#allocation2] sm:$0xff] %vm482_vm1, %v2275_v32  ;;  %824 = vperm.xlu0 %1733, %v2275_v32   ;;  %v1140_v37 = vmul.f32 0.6931472, %v1776_v42  ;;  %v1122_v39 = vld [vmem:[#allocation5 + $0x18] sm:$0xff]  ;;  %1777 = vlog2.f32 %v1120_v33  ;;  %v1111_v33 = vld [vmem:[#allocation4] sm:$0xff] }
 0x219   : > { %1086 = vst.msk [vmem:[#allocation5] sm:$0xff] %vm482_vm1, %v1078_v15  ;;  %v1209_v41 = vsub.f32 %v2270_v56, %v1208_v29  ;;  %v1147_v48 = vadd.f32 %v1136_v31, %v1115_v38  ;;  %1779 = vlog2.f32 %v1122_v39  ;;  %v1121_v49 = vld [vmem:[#allocation5 + $0x10] sm:$0xff]  ;;  %v1419_v31 = vmul.f32 -0.5, %v1418_v47 }
 0x21a   : > { %v1149_v52 = vadd.f32 %v1140_v37, %v1117_v40  ;;  %1781 = vlog2.f32 %v1121_v49  ;;  %v1192_v39 = vsub.f32 %v1190_v3, %v1191_v35 }
 0x21b   : > { %v1210_v53 = vand.u32 4294901760, %v1209_v41  ;;  %v2301_v59 = vand.u32 4294901760, %v1147_v48  ;;  %v1420_v40 = vsel %vm504_vm0, %v1419_v31, 0.0 }
 0x21c   : > { %v2303_v45 = vand.u32 4294901760, %v1149_v52  ;;  %1421 = vadd.xlane.f32.xlu1 %v1420_v40 }
 0x21d   : > { %1211 = vmatpush.msra.mxu1 %v1210_v53  ;;  %v2309_v54 = vsub.f32 %v1147_v48, %v2301_v59 }
 0x21e   : > { %v1778_v63 = vpop.eup %1777  ;;  %1176 = vmatpush.msra.mxu0 %v2303_v45  ;;  %1308 = vmatpush.msra.mxu3 %v2303_v45  ;;  %v2315_v1 = vsub.f32 %v1149_v52, %v2303_v45 }
 0x21f   : > { %v1780_v2 = vpop.eup %1779  ;;  %v1130_v7 = vmul.f32 0.6931472, %v1778_v63  ;;  %v1226_v25 = vand.u32 4294901760, %v2309_v54 }
 0x220   : > { %v1782_v5 = vpop.eup %1781  ;;  %1178 = vmatpush.msra.mxu0 %v2272_v60  ;;  %1272 = vmatpush.msra.mxu2 %v2315_v1  ;;  %v1134_v6 = vmul.f32 0.6931472, %v1780_v2  ;;  %v1214_v0 = vand.u32 4294901760, %v2315_v1  ;;  %v1119_v10 = vld [vmem:[#allocation5] sm:$0xff]  ;;  %v1193_v2 = vand.u32 4294901760, %v1192_v39 }
 0x221   : > { %1310 = vmatpush.msra.mxu3 %v2272_v60  ;;  %v1132_v55 = vmul.f32 0.6931472, %v1782_v5  ;;  %v1144_v58 = vadd.f32 %v1130_v7, %v1112_v9  ;;  %1783 = vlog2.f32 %v1119_v10  ;;  %v1227_v16 = vsub.f32 %v2309_v54, %v1226_v25 }
 0x222   : > { %1180 = vmatpush.msra.mxu0 %v2301_v59  ;;  %1275 = vmatpush.msra.mxu2 %v2295_v44  ;;  %v1146_v12 = vadd.f32 %v1134_v6, %v1114_v11  ;;  %v1215_v13 = vsub.f32 %v2315_v1, %v1214_v0 }
 0x223   : > { %1312 = vmatpush.msra.mxu3 %v2301_v59  ;;  %v1145_v14 = vadd.f32 %v1132_v55, %v1113_v18  ;;  %v2333_v17 = vand.u32 4294901760, %v1144_v58  ;;  %v1228_v26 = vand.u32 4294901760, %v1227_v16 }
 0x224   : > { %1278 = vmatpush.msra.mxu2 %v2309_v54  ;;  %v2339_v4 = vand.u32 4294901760, %v1146_v12  ;;  %v1216_v20 = vand.u32 4294901760, %v1215_v13 }
 0x225   : > { %v2341_v43 = vand.u32 4294901760, %v1145_v14  ;;  %v1243_v22 = vsub.f32 %v1144_v58, %v2333_v17 }
 0x226   : > { %1182 = vmatpush.msra.mxu0 %v2339_v4  ;;  %1217 = vmatpush.msra.mxu1 %v1216_v20  ;;  %v1231_v28 = vsub.f32 %v1146_v12, %v2339_v4 }
 0x227   : > { %v1784_v50 = vpop.eup %1783  ;;  %1314 = vmatpush.msra.mxu3 %v2339_v4  ;;  %v1237_v30 = vsub.f32 %v1145_v14, %v2341_v43  ;;  %v1244_v15 = vand.u32 4294901760, %v1243_v22 }
 0x228   : > { %1184 = vmatpush.msra.mxu0 %v2341_v43  ;;  %1223 = vmatpush.msra.mxu1 %v1222_v23  ;;  %v1128_v61 = vmul.f32 0.6931472, %v1784_v50  ;;  %v1232_v42 = vand.u32 4294901760, %v1231_v28 }
 0x229   : > { %1281 = vmatpush.msra.mxu2 %v1231_v28  ;;  %1316 = vmatpush.msra.mxu3 %v2341_v43  ;;  %v1238_v37 = vand.u32 4294901760, %v1237_v30  ;;  %v1245_v52 = vsub.f32 %v1243_v22, %v1244_v15 }
 0x22a   : > { %1186 = vmatpush.msra.mxu0 %v2333_v17  ;;  %1229 = vmatpush.msra.mxu1 %v1228_v26  ;;  %v1143_v21 = vadd.f32 %v1128_v61, %v1111_v33  ;;  %v1233_v38 = vsub.f32 %v1231_v28, %v1232_v42  ;;  %v819_v26 = vmul.f32 1.442695, %v818_v34  ;;  %v817_v61 = vld [vmem:[#allocation3] sm:$0xff] }
 0x22b   : > { %1284 = vmatpush.msra.mxu2 %v1237_v30  ;;  %1318 = vmatpush.msra.mxu3 %v2333_v17  ;;  %v1239_v41 = vsub.f32 %v1237_v30, %v1238_v37  ;;  %v1246_v7 = vand.u32 4294901760, %v1245_v52 }
 0x22c   : > { %v1187_v48 = vand.u32 4294901760, %v1143_v21  ;;  %v1234_v49 = vand.u32 4294901760, %v1233_v38  ;;  %v1105_v38 = vld [vmem:[#allocation2] sm:$0xff] }
 0x22d   : > { %1287 = vmatpush.msra.mxu2 %v1243_v22  ;;  %v1240_v53 = vand.u32 4294901760, %v1239_v41 }
 0x22e   : > { %1188 = vmatpush.msra.mxu0 %v1187_v48  ;;  %1235 = vmatpush.msra.mxu1 %v1234_v49  ;;  %v1249_v63 = vsub.f32 %v1143_v21, %v1187_v48 }
 0x22f   : > { %1320 = vmatpush.msra.mxu3 %v1187_v48  ;;  %1194 = vmatmul.f32.vlgmr.msra.gmra.mxu0 %v1193_v2 }
 0x230   : > { %1339 = vmatpush.msrb.mxu0 %v1208_v29  ;;  %1241 = vmatpush.msra.mxu1 %v1240_v53  ;;  %v1250_v8 = vand.u32 4294901760, %v1249_v63  ;;  %v1403_v29 = vld [vmem:[%s448_s27] sm:$0xff] }
 0x231   : > { %1290 = vmatpush.msra.mxu2 %v1249_v63  ;;  %1324 = vmatmul.f32.vlgmr.msra.gmra.mxu3 %v1191_v35  ;;  %v1405_v54 = vsub.f32 %v2014_v19, %v1403_v29 }
 0x232   : > { %1343 = vmatpush.msrb.mxu0 %v1214_v0  ;;  %1293 = vmatmul.f32.vlgmr.msra.gmra.mxu2 %v1190_v3  ;;  %v1251_v5 = vsub.f32 %v1249_v63, %v1250_v8 }
 0x233   : > { %1247 = vmatpush.msra.mxu1 %v1246_v7 }
 0x234   : > { %1347 = vmatpush.msrb.mxu0 %v1220_v62  ;;  %v1252_v6 = vand.u32 4294901760, %v1251_v5 }
 0x236   : > { %1351 = vmatpush.msrb.mxu0 %v1226_v25  ;;  %1253 = vmatpush.msra.mxu1 %v1252_v6 }
 0x237   : > { %1667 = vmatmul.msk.f32.vlgmr.msra.gmra.mxu1 %vm1161_vm5, %v2306_v51 }
 0x238   : > { %1355 = vmatpush.msrb.mxu0 %v1232_v42  ;;  %1382 = vmatpush.msrb.mxu1 %v2263_v36  ;;  %v1404_v36 = vld [vmem:[%s452_s25] sm:$0xff]  ;;  %s1474_s25 = sshll.u32 %s1470_s18, 4  ;;  %s1475_s25 = int_to_ptr.hbm [resolvable:$true] %s1474_s25 }
 0x239   : > { %v1406_v56 = vmul.f32 -0.5, %v1404_v36  ;;  %v1426_v44 = vmul.f32 1.442695, %v1404_v36  ;;  %s1809_s26 = sshra.s32 %s1475_s25, 4  ;;  %s1810_s26 = int_to_ptr.hbm [resolvable:$true] %s1809_s26 }
 0x23a   : > { %1359 = vmatpush.msrb.mxu0 %v1238_v37  ;;  %1384 = vmatpush.msrb.mxu1 %v2303_v45  ;;  %v1424_v45 = vmul.f32 %v1403_v29, %v1403_v29  ;;  %s1811_s12 = scalar_lea.hbm %s1810_s26, 8  ;;  %p1816_p2 = scmp.lt.s32.totalorder %s1810_s26, %s2441_s9 }
 0x23b   : > { %p1812_p13 = scmp.ne.s32.totalorder %s1810_s26, %s1811_s12  ;;  %p1817_p3 = scmp.lt.s32.totalorder %s1815_s15, %s1811_s12 }
 0x23c   : > { %1363 = vmatpush.msrb.mxu0 %v1244_v15  ;;  %1386 = vmatpush.msrb.mxu1 %v2272_v60  ;;  %v1407_v60 = vmul.f32 1.442695, %v1406_v56 }
 0x23d   : > { %p1813_p0 = pnand %p1812_p13, %p1968_p4  ;;  %p1818_p5 = por %p1817_p3, %p1816_p2 }
 0x23e   : > { %1367 = vmatpush.msrb.mxu0 %v1250_v8  ;;  %1388 = vmatpush.msrb.mxu1 %v2301_v59  ;;  %1785 = vpow2.f32 %v1407_v60  ;;  %v1423_v59 = vadd.f32 1.0, %v1404_v36 }
 0x23f   : > { %1668 = vmatmul.msk.f32.vlgmr.msrb.gmra.mxu0 %vm1161_vm5, %v2306_v51  ;;  %1787 = vpow2.f32 %v1426_v44  ;;  %p1814_p1 = pneg %p1813_p0 }
 0x240   : > { %1390 = vmatpush.msrb.mxu1 %v2339_v4 }
 0x241   : > { %p1819_p6 = pnand %p1818_p5, %p1814_p1 }
 0x242   : > { %1392 = vmatpush.msrb.mxu1 %v2341_v43 }
 0x244   : > { %1394 = vmatpush.msrb.mxu1 %v2333_v17  ;;  %v1786_v62 = vpop.eup %1785 }
 0x245   : > { %v1788_v1 = vpop.eup %1787  ;;  %v1409_v25 = vmul.f32 %v1786_v62, %v1405_v54 }
 0x246   : > { %1396 = vmatpush.msrb.mxu1 %v1187_v48 }
 0x247   : > { %1669 = vmatmul.msk.f32.vlgmr.msrb.gmra.mxu1 %vm1161_vm5, %v2306_v51  ;;  %v1425_v51 = vsub.f32 %v1423_v59, %v1424_v45  ;;  %v1410_v55 = vmul.f32 %v1409_v25, %v1409_v25 }
 0x249   : > { %v1428_v0 = vsub.f32 %v1425_v51, %v1788_v1  ;;  %v1411_v58 = vadd.f32 %v1410_v55, %v1404_v36 }
 0x24b   : > { %v1429_v9 = vsel %vm504_vm0, %v1428_v0, 0.0  ;;  %v1412_v12 = vadd.f32 1.837877, %v1411_v58 }
 0x24c   : > { %1430 = vadd.xlane.f32.xlu1 %v1429_v9 }
 0x24d   : > { %v1413_v18 = vmul.f32 -0.5, %v1412_v12 }
 0x24f   : > { %v1414_v19 = vsel %vm504_vm0, %v1413_v18, 0.0 }
 0x28a   : > { %v825_v10 = vpop.permute.xlu0 %824 }
 0x28b   : > { %v827_v11 = vsub.f32 %v2227_v27, %v825_v10 }
 0x28d   : > { %v828_v57 = vmul.f32 1.442695, %v827_v11 }
 0x28f   : > { %1789 = vpow2.f32 %v828_v57  ;;  %v1422_v35 = vpop.xlane.xlu1 %1421 }
 0x290   : > { %1791 = vpow2.f32 %v819_v26 }
 0x295   : > { %v1790_v13 = vpop.eup %1789 }
 0x296   : > { %830 = vadd.xlane.f32.xlu2 %v1790_v13  ;;  %v1792_v30 = vpop.eup %1791 }
 0x297   : > { %v821_v42 = vmul.f32 %v1792_v30, %v817_v61 }
 0x29e   : > { %1415 = vadd.xlane.f32.xlu2 %v1414_v19 }
 0x2ac   : > { %v1195_v3 = vpop.f32.mrf.mxu0 }
 0x2b4   : > { %v1256_v14 = vpop.f32.mrf.mxu1  ;;  %v1325_v20 = vpop.f32.mrf.mxu3 }
 0x2b5   : > { %v1294_v17 = vpop.f32.mrf.mxu2  ;;  %v1257_v16 = vadd.f32 %v1256_v14, %v1195_v3 }
 0x2b7   : > { %v1295_v4 = vadd.f32 %v1294_v17, %v1257_v16 }
 0x2b9   : > { %v1326_v43 = vadd.f32 %v1325_v20, %v1295_v4 }
 0x2bc   : > { %v1370_v22 = vpop.f32.mrf.mxu0 }
 0x2bd   : > { %v1371_v27 = vadd.f32 %v1370_v22, %v1326_v43 }
 0x2bf   : > { %v1431_v34 = vpop.xlane.xlu1 %1430 }
 0x2c0   : > { %v1439_v48 = vsel %vm1438_vm6, %v1431_v34, 0.0 }
 0x2c4   : > { %v1399_v23 = vpop.f32.mrf.mxu1 }
 0x2c5   : > { %v1400_v28 = vadd.f32 %v1399_v23, %v1371_v27 }
 0x2c7   : > { %v1670_v47 = vadd.f32 -77.44275, %v1400_v28 }
 0x2c9   : > { %v1437_v50 = vsub.f32 %v1670_v47, %v1422_v35 }
 0x2cb   : > { %1442 = vperm.xlu2 %1735, %v1437_v50  }
 0x309   : > { %v831_v15 = vpop.xlane.xlu2 %830 }
 0x30a   : > { %v832_v31 = vadd.f32 %v831_v15, %v821_v42 }
 0x30c   : > { %834 = vst.msk [vmem:[#allocation3] sm:$0xff] %vm482_vm1, %v832_v31 }
 0x311   : > { %v1416_v41 = vpop.xlane.xlu2 %1415 }
 0x313   : > { %v1106_v33 = vld [vmem:[#allocation3] sm:$0xff] }
 0x314   : > { %1793 = vlog2.f32 %v1106_v33 }
 0x31a   : > { %v1794_v37 = vpop.eup %1793 }
 0x31b   : > { %v1108_v21 = vmul.f32 0.6931472, %v1794_v37 }
 0x31d   : > { %v1109_v39 = vadd.f32 %v1108_v21, %v1105_v38 }
 0x31f   : > { %v1666_v40 = vadd.f32 -9.680344, %v1109_v39 }
 0x321   : > { %v1433_v46 = vsub.f32 %v1416_v41, %v1666_v40  ;;  %v1435_v32 = vsub.f32 %v1666_v40, %v1670_v47 }
 0x323   : > { %1448 = vperm.xlu0 %1733, %v1435_v32   ;;  %1454 = vperm.xlu1 %1734, %v1433_v46  }
 0x325   : > { %v1443_v49 = vpop.permute.xlu2 %1442 }
 0x326   : > { %v1445_v52 = vsel %vm1436_vm7, %v1443_v49, %v1439_v48 }
 0x395   : > { %v1449_v53 = vpop.permute.xlu0 %1448  ;;  %v1455_v63 = vpop.permute.xlu1 %1454 }
 0x396   : > { %v1451_v2 = vsel %vm1434_vm8, %v1449_v53, %v1445_v52 }
 0x397   : > { %v1457_v7 = vsel %vm1432_vm9, %v1455_v63, %v1451_v2 }
 0x398   : > { %1458 = vst [vmem:[%s440_s20] sm:$0xff] %v1457_v7 }
 0x399   : > { %1822 = shalt.err (!%p1819_p6)
}
 0x39a   : > { %1675 = dma.vmem_to_hbm [thread:$0]  (%p1968_p4), %s1473_s24, 128, %s1475_s25, %s1460_s23  }
 0x39b PF: > { %p1681_p7 = scmp.ge.s32.totalorder %s1873_s14, 2  ;;  %s1486_s29 = sand.u32 1, %s1853_s30  }
 0x39c   : > { %s1487_s20 = scalar_lea.sflag [#allocation7], %s1486_s29 }
 0x39d   : > { %p1678_p9 = pnand %p1681_p7, %p1975_p8 }
 0x39f   : > { %p1679_p10 = pneg %p1678_p9 }
 0x3a1   : > { %1848 = dma.done.wait (%p1679_p10), %s1487_s20, 128  }
 0x3a2   : > { %1850 = vsyncadd (%p1679_p10), %s1487_s20, 4294967168  ;;  %s22_s14 = sadd.s32 1, %s1873_s14   ;;  %s2446_s30 = smov %s1857_s10 }
 0x3a3   : > { %p19_p11 = scmp.ge.s32.totalorder %s22_s14, 4   ;;  %s2447_s10 = smov %s1861_s11 }
 0x3a4   : > { %s2448_s11 = smov %s1981_s22  ;;  %s2449_s12 = smov %s1869_s13 }
 0x3a5   : > { %s2450_s13 = smov %s2452_s17  ;;  %21 = sbr.rel (!%p19_p11) target bundleno = 4 (0x4), region = 123 }
 0x3aa   :  { %1493 = vsyncpa [#allocation7], 1 }
 0x3ab   :  { %1495 = vsyncpa [#allocation7 + $0x1], 1 }

</bundles_post_ra>
